<compile_context>
chip_gen: v7x
topology: tpu7x:2x2x1
jax: 0.10.0
libtpu: 0.0.40
codegen_flags: <defaults>
</compile_context>

<pallas_src>
import jax
import jax.numpy as jnp
from jax import lax
from jax.experimental import pallas as pl
from jax.experimental.pallas import tpu as pltpu

EPS = 1e-5


# ------------------------------ fused kernel --------------------------------

def _make_rsbu_kernel(c_in, c_out, k_size, l_out, down_sample, b_blk):
    assert k_size == 3  # padding=1 in the module only makes sense for K=3

    def kernel(*refs):
        if down_sample:
            (xe_ref, xo_ref, w1_ref, w2_ref, fc1t_ref, fc2_ref,
             cc_ref, cr_ref, o_ref, pad_ref) = refs
        else:
            (xe_ref, w1_ref, w2_ref, fc1t_ref, fc2_ref,
             cc_ref, cr_ref, o_ref, pad_ref) = refs
            xo_ref = None

        # ---- packed per-channel constants ----
        s1 = cc_ref[0:c_in, 0:1]        # BN1 scale   (column -> broadcast on lanes)
        b1 = cc_ref[0:c_in, 1:2]        # BN1 bias
        s2 = cc_ref[0:c_out, 2:3]       # BN2 scale
        b2 = cc_ref[0:c_out, 3:4]       # BN2 bias (conv1 bias folded in)
        c2b = cc_ref[0:c_out, 4:5]      # conv2 bias
        fc2b = cc_ref[0:c_out, 5:6]     # FC2 bias
        fc1b = cr_ref[0:1, :]           # FC1 bias    (row)
        s3 = cr_ref[1:2, :]             # BN3 scale   (row)
        b3 = cr_ref[2:3, :]             # BN3 bias    (row)

        # zero the two padding lanes of the sliding-window scratch
        c_max = pad_ref.shape[1]
        zcol = jnp.zeros((b_blk, c_max, 1), jnp.float32)
        pad_ref[:, :, 0:1] = zcol
        pad_ref[:, :, l_out + 1:l_out + 2] = zcol

        # ---- BN1 + ReLU (keep the raw input around for the residual) ----
        xa = xe_ref[...]                                    # (B, C_in, L_out) raw
        y1a = jnp.maximum(xa * s1 + b1, 0.0)
        if down_sample:
            # even/odd decomposition of the stride-2 conv:
            # out[j] uses y1[2j-1], y1[2j], y1[2j+1] = odd[j-1], even[j], odd[j]
            y1o = jnp.maximum(xo_ref[...] * s1 + b1, 0.0)
            pad_ref[:, 0:c_in, 1:1 + l_out] = y1o
            taps1 = (pad_ref[:, 0:c_in, 0:l_out], y1a, y1o)
        else:
            pad_ref[:, 0:c_in, 1:1 + l_out] = y1a
            taps1 = tuple(pad_ref[:, 0:c_in, k:k + l_out] for k in range(k_size))

        # ---- Conv1 as VPU broadcast-FMA outer products over (c, k) ----
        acc1 = jnp.zeros((b_blk, c_out, l_out), jnp.float32)
        for c in range(c_in):
            for k in range(k_size):
                acc1 = acc1 + w1_ref[c * k_size + k] * taps1[k][:, c:c + 1, :]

        # ---- BN2 + ReLU (conv1 bias already folded into b2) ----
        y2 = jnp.maximum(acc1 * s2 + b2, 0.0)               # (B, C_out, L_out)
        pad_ref[:, 0:c_out, 1:1 + l_out] = y2
        taps2 = tuple(pad_ref[:, 0:c_out, k:k + l_out] for k in range(k_size))

        # ---- Conv2 (stride 1) ----
        acc2 = jnp.zeros((b_blk, c_out, l_out), jnp.float32)
        for c in range(c_out):
            for k in range(k_size):
                acc2 = acc2 + w2_ref[c * k_size + k] * taps2[k][:, c:c + 1, :]
        z = acc2 + c2b                                      # (B, C_out, L_out)

        # ---- GAP over length + channel-wise gate (tiny FCs on VPU/XLU) ----
        z_abs = jnp.abs(z)
        gap = jnp.sum(z_abs, axis=-1, keepdims=True) * (1.0 / l_out)      # (B, C_out, 1)
        h = jnp.sum(fc1t_ref[...] * gap, axis=1, keepdims=True) + fc1b    # (B, 1, C_out)
        h = jnp.maximum(h * s3 + b3, 0.0)
        logits = jnp.sum(fc2_ref[...] * h, axis=-1, keepdims=True) + fc2b  # (B, C_out, 1)
        alpha = jax.nn.sigmoid(logits)
        thr = gap * alpha                                   # (B, C_out, 1), thr >= 0

        # soft threshold: sign(z) * max(|z| - thr, 0) == z - clip(z, -thr, thr)
        out = z - jnp.clip(z, -thr, thr)

        # ---- residual add; channel zero-padding = only first C_in rows get it ----
        if c_in == c_out:
            o_ref[...] = out + xa
        else:
            o_ref[:, 0:c_in, :] = out[:, 0:c_in, :] + xa
            o_ref[:, c_in:c_out, :] = out[:, c_in:c_out, :]

    return kernel


# --------------------------------- wrapper ----------------------------------

def _bn_fold(gamma, beta, mean, var):
    scale = gamma / jnp.sqrt(var + EPS)
    return scale, beta - mean * scale


def rsbu_cw_forward(x, params, in_channels, out_channels, kernel_size,
                    down_sample, b_blk=None):
    """x: (N, C_in, L) float32, NCL like PyTorch. Returns (N, C_out, L_out)."""
    n, c_in, l = x.shape
    assert c_in == in_channels
    assert kernel_size == 3
    assert in_channels == out_channels or out_channels == 2 * in_channels
    c_out, k = out_channels, kernel_size

    if down_sample:
        assert l % 2 == 0, "down_sample path assumes an even input length"
        l_out = l // 2
        xa = x[:, :, 0::2]   # even samples (also the AvgPool1d(k=1,s=2) residual)
        xb = x[:, :, 1::2]   # odd samples
    else:
        l_out = l
        xa, xb = x, None

    c_max = max(c_in, c_out)

    # ---- choose a batch block: amortize per-step overhead, stay inside VMEM ----
    if b_blk is None:
        # rough per-batch-element working set: inputs + scratch + intermediates
        # + output, double-buffered.  Keep the block comfortably under 8 MiB.
        bytes_per_elem = 4 * c_max * (l_out + 2) * 12
        cap = max(1, (8 << 20) // max(bytes_per_elem, 1))
        b_blk = 1
        for cand in (8, 4, 2, 1):
            if cand <= cap and n % cand == 0:
                b_blk = cand
                break
    assert n % b_blk == 0

    # fold eval-mode BatchNorms; fold conv1 bias into the BN2 affine
    s1, b1 = _bn_fold(params['bn1_gamma'], params['bn1_beta'],
                      params['bn1_mean'], params['bn1_var'])
    s2, b2 = _bn_fold(params['bn2_gamma'], params['bn2_beta'],
                      params['bn2_mean'], params['bn2_var'])
    b2 = b2 + s2 * params['conv1_b']
    s3, b3 = _bn_fold(params['bn3_gamma'], params['bn3_beta'],
                      params['bn3_mean'], params['bn3_var'])

    # conv weights repacked as (C*K, C_out, 1) columns for broadcast-FMA
    w1p = jnp.transpose(params['conv1_w'], (1, 2, 0)).reshape(c_in * k, c_out)[:, :, None]
    w2p = jnp.transpose(params['conv2_w'], (1, 2, 0)).reshape(c_out * k, c_out)[:, :, None]
    fc1t = params['fc1_w'].T          # (in, out)
    fc2 = params['fc2_w']             # (out, in)

    # per-channel constants packed into two small VMEM-resident blocks
    def col(v):
        return jnp.pad(v, (0, c_max - v.shape[0]))[:, None]

    cc = jnp.concatenate([col(s1), col(b1), col(s2), col(b2),
                          col(params['conv2_b']), col(params['fc2_b'])], axis=1)
    cr = jnp.stack([params['fc1_b'], s3, b3], axis=0)        # (3, C_out)

    x_spec = pl.BlockSpec((b_blk, c_in, l_out), lambda i: (i, 0, 0))

    def resident(a):
        nd = a.ndim
        return pl.BlockSpec(a.shape, lambda i, nd=nd: (0,) * nd)

    consts = [w1p, w2p, fc1t, fc2, cc, cr]
    if down_sample:
        inputs = [xa, xb] + consts
        in_specs = [x_spec, x_spec] + [resident(a) for a in consts]
    else:
        inputs = [xa] + consts
        in_specs = [x_spec] + [resident(a) for a in consts]

    kernel = _make_rsbu_kernel(c_in, c_out, k, l_out, down_sample, b_blk)

    return pl.pallas_call(
        kernel,
        out_shape=jax.ShapeDtypeStruct((n, c_out, l_out), jnp.float32),
        grid=(n // b_blk,),
        in_specs=in_specs,
        out_specs=pl.BlockSpec((b_blk, c_out, l_out), lambda i: (i, 0, 0)),
        scratch_shapes=[pltpu.VMEM((b_blk, c_max, l_out + 2), jnp.float32)],
        compiler_params=pltpu.CompilerParams(
            dimension_semantics=("parallel",)),
    )(*inputs)


# ----------------------------- pure-JAX reference ----------------------------

def _reference(x, params, in_channels, out_channels, kernel_size, down_sample):
    stride = 2 if down_sample else 1

    def bn(z, g, b, m, v):
        if z.ndim == 3:
            g, b, m, v = (t[None, :, None] for t in (g, b, m, v))
        else:
            g, b, m, v = (t[None, :] for t in (g, b, m, v))
        return (z - m) / jnp.sqrt(v + EPS) * g + b

    y = jnp.maximum(bn(x, params['bn1_gamma'], params['bn1_beta'],
                       params['bn1_mean'], params['bn1_var']), 0.0)
    y = lax.conv_general_dilated(y, params['conv1_w'], (stride,), [(1, 1)],
                                 dimension_numbers=('NCH', 'OIH', 'NCH'))
    y = y + params['conv1_b'][None, :, None]
    y = jnp.maximum(bn(y, params['bn2_gamma'], params['bn2_beta'],
                       params['bn2_mean'], params['bn2_var']), 0.0)
    y = lax.conv_general_dilated(y, params['conv2_w'], (1,), [(1, 1)],
                                 dimension_numbers=('NCH', 'OIH', 'NCH'))
    y = y + params['conv2_b'][None, :, None]

    x_abs = jnp.abs(y)
    gap = jnp.mean(x_abs, axis=2)
    h = gap @ params['fc1_w'].T + params['fc1_b']
    h = jnp.maximum(bn(h, params['bn3_gamma'], params['bn3_beta'],
                       params['bn3_mean'], params['bn3_var']), 0.0)
    alpha = jax.nn.sigmoid(h @ params['fc2_w'].T + params['fc2_b'])
    thr = (gap * alpha)[:, :, None]
    n_sub = jnp.maximum(x_abs - thr, 0.0)
    out = jnp.sign(y) * n_sub

    res = x
    if down_sample:
        res = res[:, :, ::2]
    if in_channels != out_channels:
        res = jnp.concatenate([res, jnp.zeros_like(res)], axis=1)
    return out + res


# ---------------------------------- main -------------------------------------

def _make_params(key, c_in, c_out):
    k = 3
    keys = jax.random.split(key, 22)

    def nrm(kk, shape, scale=0.1):
        return scale * jax.random.normal(kk, shape, jnp.float32)

    return {
        'bn1_gamma': 1.0 + nrm(keys[0], (c_in,)),
        'bn1_beta': nrm(keys[1], (c_in,)),
        'bn1_mean': nrm(keys[2], (c_in,)),
        'bn1_var': 1.0 + 0.2 * jax.random.uniform(keys[3], (c_in,), jnp.float32),
        'conv1_w': nrm(keys[4], (c_out, c_in, k), 0.3),
        'conv1_b': nrm(keys[5], (c_out,)),
        'bn2_gamma': 1.0 + nrm(keys[6], (c_out,)),
        'bn2_beta': nrm(keys[7], (c_out,)),
        'bn2_mean': nrm(keys[8], (c_out,)),
        'bn2_var': 1.0 + 0.2 * jax.random.uniform(keys[9], (c_out,), jnp.float32),
        'conv2_w': nrm(keys[10], (c_out, c_out, k), 0.3),
        'conv2_b': nrm(keys[11], (c_out,)),
        'fc1_w': nrm(keys[12], (c_out, c_out), 0.3),
        'fc1_b': nrm(keys[13], (c_out,)),
        'bn3_gamma': 1.0 + nrm(keys[14], (c_out,)),
        'bn3_beta': nrm(keys[15], (c_out,)),
        'bn3_mean': nrm(keys[16], (c_out,)),
        'bn3_var': 1.0 + 0.2 * jax.random.uniform(keys[17], (c_out,), jnp.float32),
        'fc2_w': nrm(keys[18], (c_out, c_out), 0.3),
        'fc2_b': nrm(keys[19], (c_out,)),
    }


if __name__ == "__main__":
    key = jax.random.PRNGKey(0)
    k_p1, k_x1, k_p2, k_x2, k_p3, k_x3 = jax.random.split(key, 6)

    # --- case 1: down-sampling block, channels 4 -> 8 ---
    N, C_IN, C_OUT, K, L = 2, 4, 8, 3, 16
    params = _make_params(k_p1, C_IN, C_OUT)
    x = jax.random.normal(k_x1, (N, C_IN, L), jnp.float32)

    out = jax.block_until_ready(
        rsbu_cw_forward(x, params, C_IN, C_OUT, K, down_sample=True))
    ref = _reference(x, params, C_IN, C_OUT, K, down_sample=True)
    if not jnp.allclose(out, ref, atol=1e-3, rtol=1e-3):
        raise AssertionError("Pallas RSBU_CW (down_sample) does not match reference")

    # --- case 2: identity block, channels 8 -> 8, no down-sampling ---
    C2 = 8
    params2 = _make_params(k_p2, C2, C2)
    x2 = jax.random.normal(k_x2, (N, C2, L), jnp.float32)

    out2 = jax.block_until_ready(
        rsbu_cw_forward(x2, params2, C2, C2, K, down_sample=False))
    ref2 = _reference(x2, params2, C2, C2, K, down_sample=False)
    if not jnp.allclose(out2, ref2, atol=1e-3, rtol=1e-3):
        raise AssertionError("Pallas RSBU_CW (identity) does not match reference")

    # --- case 3: multi-step grid (batch block 2, 3 grid steps), 4 -> 8 down ---
    N3 = 6
    params3 = _make_params(k_p3, C_IN, C_OUT)
    x3 = jax.random.normal(k_x3, (N3, C_IN, L), jnp.float32)

    out3 = jax.block_until_ready(
        rsbu_cw_forward(x3, params3, C_IN, C_OUT, K, down_sample=True, b_blk=2))
    ref3 = _reference(x3, params3, C_IN, C_OUT, K, down_sample=True)
    if not jnp.allclose(out3, ref3, atol=1e-3, rtol=1e-3):
        raise AssertionError("Pallas RSBU_CW (batched grid) does not match reference")

    print("KERNEL_OK")
</pallas_src>

<mosaic_0001>
module attributes {stable_mosaic.version = 11 : i64} {
  func.func @kernel(%arg0: i32, %arg1: memref<2x4x8xf32, #tpu.memory_space<vmem>>, %arg2: memref<2x4x8xf32, #tpu.memory_space<vmem>>, %arg3: memref<12x8x1xf32, #tpu.memory_space<vmem>>, %arg4: memref<24x8x1xf32, #tpu.memory_space<vmem>>, %arg5: memref<8x8xf32, #tpu.memory_space<vmem>>, %arg6: memref<8x8xf32, #tpu.memory_space<vmem>>, %arg7: memref<8x6xf32, #tpu.memory_space<vmem>>, %arg8: memref<3x8xf32, #tpu.memory_space<vmem>>, %arg9: memref<2x8x8xf32, #tpu.memory_space<vmem>>, %arg10: memref<2x8x10xf32, #tpu.memory_space<vmem>>) attributes {dimension_semantics = [#tpu.dimension_semantics<parallel>], iteration_bounds = array<i64: 1>, scalar_prefetch = 0 : i64, scratch_operands = 1 : i64, tpu.core_type = #tpu.core_type<tc>, window_params = [{transform_indices = @transform_0, window_bounds = array<i64: 2, 4, 8>}, {transform_indices = @transform_1, window_bounds = array<i64: 2, 4, 8>}, {pipeline_mode = #tpu.pipeline_mode<synchronous>, transform_indices = @transform_2, window_bounds = array<i64: 12, 8, 1>}, {pipeline_mode = #tpu.pipeline_mode<synchronous>, transform_indices = @transform_3, window_bounds = array<i64: 24, 8, 1>}, {pipeline_mode = #tpu.pipeline_mode<synchronous>, transform_indices = @transform_4, window_bounds = array<i64: 8, 8>}, {pipeline_mode = #tpu.pipeline_mode<synchronous>, transform_indices = @transform_5, window_bounds = array<i64: 8, 8>}, {pipeline_mode = #tpu.pipeline_mode<synchronous>, transform_indices = @transform_6, window_bounds = array<i64: 8, 6>}, {pipeline_mode = #tpu.pipeline_mode<synchronous>, transform_indices = @transform_7, window_bounds = array<i64: 3, 8>}, {transform_indices = @transform_8, window_bounds = array<i64: 2, 8, 8>}]} {
    %c0 = arith.constant 0 : index
    %c0_0 = arith.constant 0 : index
    %0 = vector.load %arg7[%c0, %c0_0] : memref<8x6xf32, #tpu.memory_space<vmem>>, vector<4x1xf32>
    %c0_1 = arith.constant 0 : index
    %c1 = arith.constant 1 : index
    %1 = vector.load %arg7[%c0_1, %c1] : memref<8x6xf32, #tpu.memory_space<vmem>>, vector<4x1xf32>
    %c0_2 = arith.constant 0 : index
    %c2 = arith.constant 2 : index
    %2 = vector.load %arg7[%c0_2, %c2] : memref<8x6xf32, #tpu.memory_space<vmem>>, vector<8x1xf32>
    %c0_3 = arith.constant 0 : index
    %c3 = arith.constant 3 : index
    %3 = vector.load %arg7[%c0_3, %c3] : memref<8x6xf32, #tpu.memory_space<vmem>>, vector<8x1xf32>
    %c0_4 = arith.constant 0 : index
    %c4 = arith.constant 4 : index
    %4 = vector.load %arg7[%c0_4, %c4] : memref<8x6xf32, #tpu.memory_space<vmem>>, vector<8x1xf32>
    %c0_5 = arith.constant 0 : index
    %c5 = arith.constant 5 : index
    %5 = vector.load %arg7[%c0_5, %c5] : memref<8x6xf32, #tpu.memory_space<vmem>>, vector<8x1xf32>
    %c0_6 = arith.constant 0 : index
    %c0_7 = arith.constant 0 : index
    %6 = vector.load %arg8[%c0_6, %c0_7] : memref<3x8xf32, #tpu.memory_space<vmem>>, vector<1x8xf32>
    %c1_8 = arith.constant 1 : index
    %c0_9 = arith.constant 0 : index
    %7 = vector.load %arg8[%c1_8, %c0_9] : memref<3x8xf32, #tpu.memory_space<vmem>>, vector<1x8xf32>
    %c2_10 = arith.constant 2 : index
    %c0_11 = arith.constant 0 : index
    %8 = vector.load %arg8[%c2_10, %c0_11] : memref<3x8xf32, #tpu.memory_space<vmem>>, vector<1x8xf32>
    %cst = arith.constant 0.000000e+00 : f32
    %9 = vector.broadcast %cst : f32 to vector<2x8x1xf32>
    %c0_12 = arith.constant 0 : index
    %c0_13 = arith.constant 0 : index
    %c0_14 = arith.constant 0 : index
    %10 = vector.load %arg10[%c0_12, %c0_13, %c0_14] : memref<2x8x10xf32, #tpu.memory_space<vmem>>, vector<2x8x1xf32>
    tpu.vector_store %arg10[%c0_12, %c0_13, %c0_14], %9 {strides = array<i32>} : memref<2x8x10xf32, #tpu.memory_space<vmem>>, vector<2x8x1xf32>,
    %c0_15 = arith.constant 0 : index
    %c0_16 = arith.constant 0 : index
    %c9 = arith.constant 9 : index
    %11 = vector.load %arg10[%c0_15, %c0_16, %c9] : memref<2x8x10xf32, #tpu.memory_space<vmem>>, vector<2x8x1xf32>
    tpu.vector_store %arg10[%c0_15, %c0_16, %c9], %9 {strides = array<i32>} : memref<2x8x10xf32, #tpu.memory_space<vmem>>, vector<2x8x1xf32>,
    %c0_17 = arith.constant 0 : index
    %c0_18 = arith.constant 0 : index
    %c0_19 = arith.constant 0 : index
    %12 = vector.load %arg1[%c0_17, %c0_18, %c0_19] : memref<2x4x8xf32, #tpu.memory_space<vmem>>, vector<2x4x8xf32>
    %13 = vector.shape_cast %0 : vector<4x1xf32> to vector<1x4x1xf32>
    %14 = vector.broadcast %13 : vector<1x4x1xf32> to vector<2x4x8xf32>
    %15 = arith.mulf %12, %14 : vector<2x4x8xf32>
    %16 = vector.shape_cast %1 : vector<4x1xf32> to vector<1x4x1xf32>
    %17 = vector.broadcast %16 : vector<1x4x1xf32> to vector<2x4x8xf32>
    %18 = arith.addf %15, %17 : vector<2x4x8xf32>
    %cst_20 = arith.constant 0.000000e+00 : f32
    %19 = vector.broadcast %cst_20 : f32 to vector<2x4x8xf32>
    %20 = arith.maximumf %18, %19 : vector<2x4x8xf32>
    %c0_21 = arith.constant 0 : index
    %c0_22 = arith.constant 0 : index
    %c0_23 = arith.constant 0 : index
    %21 = vector.load %arg2[%c0_21, %c0_22, %c0_23] : memref<2x4x8xf32, #tpu.memory_space<vmem>>, vector<2x4x8xf32>
    %22 = vector.shape_cast %0 : vector<4x1xf32> to vector<1x4x1xf32>
    %23 = vector.broadcast %22 : vector<1x4x1xf32> to vector<2x4x8xf32>
    %24 = arith.mulf %21, %23 : vector<2x4x8xf32>
    %25 = vector.shape_cast %1 : vector<4x1xf32> to vector<1x4x1xf32>
    %26 = vector.broadcast %25 : vector<1x4x1xf32> to vector<2x4x8xf32>
    %27 = arith.addf %24, %26 : vector<2x4x8xf32>
    %cst_24 = arith.constant 0.000000e+00 : f32
    %28 = vector.broadcast %cst_24 : f32 to vector<2x4x8xf32>
    %29 = arith.maximumf %27, %28 : vector<2x4x8xf32>
    %c0_25 = arith.constant 0 : index
    %c0_26 = arith.constant 0 : index
    %c1_27 = arith.constant 1 : index
    %30 = vector.load %arg10[%c0_25, %c0_26, %c1_27] : memref<2x8x10xf32, #tpu.memory_space<vmem>>, vector<2x4x8xf32>
    tpu.vector_store %arg10[%c0_25, %c0_26, %c1_27], %29 {strides = array<i32>} : memref<2x8x10xf32, #tpu.memory_space<vmem>>, vector<2x4x8xf32>,
    %c0_28 = arith.constant 0 : index
    %c0_29 = arith.constant 0 : index
    %c0_30 = arith.constant 0 : index
    %31 = vector.load %arg10[%c0_28, %c0_29, %c0_30] : memref<2x8x10xf32, #tpu.memory_space<vmem>>, vector<2x4x8xf32>
    %cst_31 = arith.constant 0.000000e+00 : f32
    %32 = vector.broadcast %cst_31 : f32 to vector<2x8x8xf32>
    %c0_32 = arith.constant 0 : index
    %c0_33 = arith.constant 0 : index
    %c0_34 = arith.constant 0 : index
    %33 = vector.load %arg3[%c0_32, %c0_33, %c0_34] : memref<12x8x1xf32, #tpu.memory_space<vmem>>, vector<1x8x1xf32>
    %34 = vector.shape_cast %33 : vector<1x8x1xf32> to vector<8x1xf32>
    %35 = vector.extract_strided_slice %31 {offsets = [0, 0, 0], sizes = [2, 1, 8], strides = [1, 1, 1]} : vector<2x4x8xf32> to vector<2x1x8xf32>
    %36 = vector.shape_cast %34 : vector<8x1xf32> to vector<1x8x1xf32>
    %37 = vector.broadcast %36 : vector<1x8x1xf32> to vector<2x8x8xf32>
    %38 = vector.broadcast %35 : vector<2x1x8xf32> to vector<2x8x8xf32>
    %39 = arith.mulf %37, %38 : vector<2x8x8xf32>
    %40 = arith.addf %32, %39 : vector<2x8x8xf32>
    %c1_35 = arith.constant 1 : index
    %c0_36 = arith.constant 0 : index
    %c0_37 = arith.constant 0 : index
    %41 = vector.load %arg3[%c1_35, %c0_36, %c0_37] : memref<12x8x1xf32, #tpu.memory_space<vmem>>, vector<1x8x1xf32>
    %42 = vector.shape_cast %41 : vector<1x8x1xf32> to vector<8x1xf32>
    %43 = vector.extract_strided_slice %20 {offsets = [0, 0, 0], sizes = [2, 1, 8], strides = [1, 1, 1]} : vector<2x4x8xf32> to vector<2x1x8xf32>
    %44 = vector.shape_cast %42 : vector<8x1xf32> to vector<1x8x1xf32>
    %45 = vector.broadcast %44 : vector<1x8x1xf32> to vector<2x8x8xf32>
    %46 = vector.broadcast %43 : vector<2x1x8xf32> to vector<2x8x8xf32>
    %47 = arith.mulf %45, %46 : vector<2x8x8xf32>
    %48 = arith.addf %40, %47 : vector<2x8x8xf32>
    %c2_38 = arith.constant 2 : index
    %c0_39 = arith.constant 0 : index
    %c0_40 = arith.constant 0 : index
    %49 = vector.load %arg3[%c2_38, %c0_39, %c0_40] : memref<12x8x1xf32, #tpu.memory_space<vmem>>, vector<1x8x1xf32>
    %50 = vector.shape_cast %49 : vector<1x8x1xf32> to vector<8x1xf32>
    %51 = vector.extract_strided_slice %29 {offsets = [0, 0, 0], sizes = [2, 1, 8], strides = [1, 1, 1]} : vector<2x4x8xf32> to vector<2x1x8xf32>
    %52 = vector.shape_cast %50 : vector<8x1xf32> to vector<1x8x1xf32>
    %53 = vector.broadcast %52 : vector<1x8x1xf32> to vector<2x8x8xf32>
    %54 = vector.broadcast %51 : vector<2x1x8xf32> to vector<2x8x8xf32>
    %55 = arith.mulf %53, %54 : vector<2x8x8xf32>
    %56 = arith.addf %48, %55 : vector<2x8x8xf32>
    %c3_41 = arith.constant 3 : index
    %c0_42 = arith.constant 0 : index
    %c0_43 = arith.constant 0 : index
    %57 = vector.load %arg3[%c3_41, %c0_42, %c0_43] : memref<12x8x1xf32, #tpu.memory_space<vmem>>, vector<1x8x1xf32>
    %58 = vector.shape_cast %57 : vector<1x8x1xf32> to vector<8x1xf32>
    %59 = vector.extract_strided_slice %31 {offsets = [0, 1, 0], sizes = [2, 1, 8], strides = [1, 1, 1]} : vector<2x4x8xf32> to vector<2x1x8xf32>
    %60 = vector.shape_cast %58 : vector<8x1xf32> to vector<1x8x1xf32>
    %61 = vector.broadcast %60 : vector<1x8x1xf32> to vector<2x8x8xf32>
    %62 = vector.broadcast %59 : vector<2x1x8xf32> to vector<2x8x8xf32>
    %63 = arith.mulf %61, %62 : vector<2x8x8xf32>
    %64 = arith.addf %56, %63 : vector<2x8x8xf32>
    %c4_44 = arith.constant 4 : index
    %c0_45 = arith.constant 0 : index
    %c0_46 = arith.constant 0 : index
    %65 = vector.load %arg3[%c4_44, %c0_45, %c0_46] : memref<12x8x1xf32, #tpu.memory_space<vmem>>, vector<1x8x1xf32>
    %66 = vector.shape_cast %65 : vector<1x8x1xf32> to vector<8x1xf32>
    %67 = vector.extract_strided_slice %20 {offsets = [0, 1, 0], sizes = [2, 1, 8], strides = [1, 1, 1]} : vector<2x4x8xf32> to vector<2x1x8xf32>
    %68 = vector.shape_cast %66 : vector<8x1xf32> to vector<1x8x1xf32>
    %69 = vector.broadcast %68 : vector<1x8x1xf32> to vector<2x8x8xf32>
    %70 = vector.broadcast %67 : vector<2x1x8xf32> to vector<2x8x8xf32>
    %71 = arith.mulf %69, %70 : vector<2x8x8xf32>
    %72 = arith.addf %64, %71 : vector<2x8x8xf32>
    %c5_47 = arith.constant 5 : index
    %c0_48 = arith.constant 0 : index
    %c0_49 = arith.constant 0 : index
    %73 = vector.load %arg3[%c5_47, %c0_48, %c0_49] : memref<12x8x1xf32, #tpu.memory_space<vmem>>, vector<1x8x1xf32>
    %74 = vector.shape_cast %73 : vector<1x8x1xf32> to vector<8x1xf32>
    %75 = vector.extract_strided_slice %29 {offsets = [0, 1, 0], sizes = [2, 1, 8], strides = [1, 1, 1]} : vector<2x4x8xf32> to vector<2x1x8xf32>
    %76 = vector.shape_cast %74 : vector<8x1xf32> to vector<1x8x1xf32>
    %77 = vector.broadcast %76 : vector<1x8x1xf32> to vector<2x8x8xf32>
    %78 = vector.broadcast %75 : vector<2x1x8xf32> to vector<2x8x8xf32>
    %79 = arith.mulf %77, %78 : vector<2x8x8xf32>
    %80 = arith.addf %72, %79 : vector<2x8x8xf32>
    %c6 = arith.constant 6 : index
    %c0_50 = arith.constant 0 : index
    %c0_51 = arith.constant 0 : index
    %81 = vector.load %arg3[%c6, %c0_50, %c0_51] : memref<12x8x1xf32, #tpu.memory_space<vmem>>, vector<1x8x1xf32>
    %82 = vector.shape_cast %81 : vector<1x8x1xf32> to vector<8x1xf32>
    %83 = vector.extract_strided_slice %31 {offsets = [0, 2, 0], sizes = [2, 1, 8], strides = [1, 1, 1]} : vector<2x4x8xf32> to vector<2x1x8xf32>
    %84 = vector.shape_cast %82 : vector<8x1xf32> to vector<1x8x1xf32>
    %85 = vector.broadcast %84 : vector<1x8x1xf32> to vector<2x8x8xf32>
    %86 = vector.broadcast %83 : vector<2x1x8xf32> to vector<2x8x8xf32>
    %87 = arith.mulf %85, %86 : vector<2x8x8xf32>
    %88 = arith.addf %80, %87 : vector<2x8x8xf32>
    %c7 = arith.constant 7 : index
    %c0_52 = arith.constant 0 : index
    %c0_53 = arith.constant 0 : index
    %89 = vector.load %arg3[%c7, %c0_52, %c0_53] : memref<12x8x1xf32, #tpu.memory_space<vmem>>, vector<1x8x1xf32>
    %90 = vector.shape_cast %89 : vector<1x8x1xf32> to vector<8x1xf32>
    %91 = vector.extract_strided_slice %20 {offsets = [0, 2, 0], sizes = [2, 1, 8], strides = [1, 1, 1]} : vector<2x4x8xf32> to vector<2x1x8xf32>
    %92 = vector.shape_cast %90 : vector<8x1xf32> to vector<1x8x1xf32>
    %93 = vector.broadcast %92 : vector<1x8x1xf32> to vector<2x8x8xf32>
    %94 = vector.broadcast %91 : vector<2x1x8xf32> to vector<2x8x8xf32>
    %95 = arith.mulf %93, %94 : vector<2x8x8xf32>
    %96 = arith.addf %88, %95 : vector<2x8x8xf32>
    %c8 = arith.constant 8 : index
    %c0_54 = arith.constant 0 : index
    %c0_55 = arith.constant 0 : index
    %97 = vector.load %arg3[%c8, %c0_54, %c0_55] : memref<12x8x1xf32, #tpu.memory_space<vmem>>, vector<1x8x1xf32>
    %98 = vector.shape_cast %97 : vector<1x8x1xf32> to vector<8x1xf32>
    %99 = vector.extract_strided_slice %29 {offsets = [0, 2, 0], sizes = [2, 1, 8], strides = [1, 1, 1]} : vector<2x4x8xf32> to vector<2x1x8xf32>
    %100 = vector.shape_cast %98 : vector<8x1xf32> to vector<1x8x1xf32>
    %101 = vector.broadcast %100 : vector<1x8x1xf32> to vector<2x8x8xf32>
    %102 = vector.broadcast %99 : vector<2x1x8xf32> to vector<2x8x8xf32>
    %103 = arith.mulf %101, %102 : vector<2x8x8xf32>
    %104 = arith.addf %96, %103 : vector<2x8x8xf32>
    %c9_56 = arith.constant 9 : index
    %c0_57 = arith.constant 0 : index
    %c0_58 = arith.constant 0 : index
    %105 = vector.load %arg3[%c9_56, %c0_57, %c0_58] : memref<12x8x1xf32, #tpu.memory_space<vmem>>, vector<1x8x1xf32>
    %106 = vector.shape_cast %105 : vector<1x8x1xf32> to vector<8x1xf32>
    %107 = vector.extract_strided_slice %31 {offsets = [0, 3, 0], sizes = [2, 1, 8], strides = [1, 1, 1]} : vector<2x4x8xf32> to vector<2x1x8xf32>
    %108 = vector.shape_cast %106 : vector<8x1xf32> to vector<1x8x1xf32>
    %109 = vector.broadcast %108 : vector<1x8x1xf32> to vector<2x8x8xf32>
    %110 = vector.broadcast %107 : vector<2x1x8xf32> to vector<2x8x8xf32>
    %111 = arith.mulf %109, %110 : vector<2x8x8xf32>
    %112 = arith.addf %104, %111 : vector<2x8x8xf32>
    %c10 = arith.constant 10 : index
    %c0_59 = arith.constant 0 : index
    %c0_60 = arith.constant 0 : index
    %113 = vector.load %arg3[%c10, %c0_59, %c0_60] : memref<12x8x1xf32, #tpu.memory_space<vmem>>, vector<1x8x1xf32>
    %114 = vector.shape_cast %113 : vector<1x8x1xf32> to vector<8x1xf32>
    %115 = vector.extract_strided_slice %20 {offsets = [0, 3, 0], sizes = [2, 1, 8], strides = [1, 1, 1]} : vector<2x4x8xf32> to vector<2x1x8xf32>
    %116 = vector.shape_cast %114 : vector<8x1xf32> to vector<1x8x1xf32>
    %117 = vector.broadcast %116 : vector<1x8x1xf32> to vector<2x8x8xf32>
    %118 = vector.broadcast %115 : vector<2x1x8xf32> to vector<2x8x8xf32>
    %119 = arith.mulf %117, %118 : vector<2x8x8xf32>
    %120 = arith.addf %112, %119 : vector<2x8x8xf32>
    %c11 = arith.constant 11 : index
    %c0_61 = arith.constant 0 : index
    %c0_62 = arith.constant 0 : index
    %121 = vector.load %arg3[%c11, %c0_61, %c0_62] : memref<12x8x1xf32, #tpu.memory_space<vmem>>, vector<1x8x1xf32>
    %122 = vector.shape_cast %121 : vector<1x8x1xf32> to vector<8x1xf32>
    %123 = vector.extract_strided_slice %29 {offsets = [0, 3, 0], sizes = [2, 1, 8], strides = [1, 1, 1]} : vector<2x4x8xf32> to vector<2x1x8xf32>
    %124 = vector.shape_cast %122 : vector<8x1xf32> to vector<1x8x1xf32>
    %125 = vector.broadcast %124 : vector<1x8x1xf32> to vector<2x8x8xf32>
    %126 = vector.broadcast %123 : vector<2x1x8xf32> to vector<2x8x8xf32>
    %127 = arith.mulf %125, %126 : vector<2x8x8xf32>
    %128 = arith.addf %120, %127 : vector<2x8x8xf32>
    %129 = vector.shape_cast %2 : vector<8x1xf32> to vector<1x8x1xf32>
    %130 = vector.broadcast %129 : vector<1x8x1xf32> to vector<2x8x8xf32>
    %131 = arith.mulf %128, %130 : vector<2x8x8xf32>
    %132 = vector.shape_cast %3 : vector<8x1xf32> to vector<1x8x1xf32>
    %133 = vector.broadcast %132 : vector<1x8x1xf32> to vector<2x8x8xf32>
    %134 = arith.addf %131, %133 : vector<2x8x8xf32>
    %cst_63 = arith.constant 0.000000e+00 : f32
    %135 = vector.broadcast %cst_63 : f32 to vector<2x8x8xf32>
    %136 = arith.maximumf %134, %135 : vector<2x8x8xf32>
    %c0_64 = arith.constant 0 : index
    %c0_65 = arith.constant 0 : index
    %c1_66 = arith.constant 1 : index
    %137 = vector.load %arg10[%c0_64, %c0_65, %c1_66] : memref<2x8x10xf32, #tpu.memory_space<vmem>>, vector<2x8x8xf32>
    tpu.vector_store %arg10[%c0_64, %c0_65, %c1_66], %136 {strides = array<i32>} : memref<2x8x10xf32, #tpu.memory_space<vmem>>, vector<2x8x8xf32>,
    %c0_67 = arith.constant 0 : index
    %c0_68 = arith.constant 0 : index
    %c0_69 = arith.constant 0 : index
    %138 = vector.load %arg10[%c0_67, %c0_68, %c0_69] : memref<2x8x10xf32, #tpu.memory_space<vmem>>, vector<2x8x8xf32>
    %c0_70 = arith.constant 0 : index
    %c0_71 = arith.constant 0 : index
    %c1_72 = arith.constant 1 : index
    %139 = vector.load %arg10[%c0_70, %c0_71, %c1_72] : memref<2x8x10xf32, #tpu.memory_space<vmem>>, vector<2x8x8xf32>
    %c0_73 = arith.constant 0 : index
    %c0_74 = arith.constant 0 : index
    %c2_75 = arith.constant 2 : index
    %140 = vector.load %arg10[%c0_73, %c0_74, %c2_75] : memref<2x8x10xf32, #tpu.memory_space<vmem>>, vector<2x8x8xf32>
    %cst_76 = arith.constant 0.000000e+00 : f32
    %141 = vector.broadcast %cst_76 : f32 to vector<2x8x8xf32>
    %c0_77 = arith.constant 0 : index
    %c0_78 = arith.constant 0 : index
    %c0_79 = arith.constant 0 : index
    %142 = vector.load %arg4[%c0_77, %c0_78, %c0_79] : memref<24x8x1xf32, #tpu.memory_space<vmem>>, vector<1x8x1xf32>
    %143 = vector.shape_cast %142 : vector<1x8x1xf32> to vector<8x1xf32>
    %144 = vector.extract_strided_slice %138 {offsets = [0, 0, 0], sizes = [2, 1, 8], strides = [1, 1, 1]} : vector<2x8x8xf32> to vector<2x1x8xf32>
    %145 = vector.shape_cast %143 : vector<8x1xf32> to vector<1x8x1xf32>
    %146 = vector.broadcast %145 : vector<1x8x1xf32> to vector<2x8x8xf32>
    %147 = vector.broadcast %144 : vector<2x1x8xf32> to vector<2x8x8xf32>
    %148 = arith.mulf %146, %147 : vector<2x8x8xf32>
    %149 = arith.addf %141, %148 : vector<2x8x8xf32>
    %c1_80 = arith.constant 1 : index
    %c0_81 = arith.constant 0 : index
    %c0_82 = arith.constant 0 : index
    %150 = vector.load %arg4[%c1_80, %c0_81, %c0_82] : memref<24x8x1xf32, #tpu.memory_space<vmem>>, vector<1x8x1xf32>
    %151 = vector.shape_cast %150 : vector<1x8x1xf32> to vector<8x1xf32>
    %152 = vector.extract_strided_slice %139 {offsets = [0, 0, 0], sizes = [2, 1, 8], strides = [1, 1, 1]} : vector<2x8x8xf32> to vector<2x1x8xf32>
    %153 = vector.shape_cast %151 : vector<8x1xf32> to vector<1x8x1xf32>
    %154 = vector.broadcast %153 : vector<1x8x1xf32> to vector<2x8x8xf32>
    %155 = vector.broadcast %152 : vector<2x1x8xf32> to vector<2x8x8xf32>
    %156 = arith.mulf %154, %155 : vector<2x8x8xf32>
    %157 = arith.addf %149, %156 : vector<2x8x8xf32>
    %c2_83 = arith.constant 2 : index
    %c0_84 = arith.constant 0 : index
    %c0_85 = arith.constant 0 : index
    %158 = vector.load %arg4[%c2_83, %c0_84, %c0_85] : memref<24x8x1xf32, #tpu.memory_space<vmem>>, vector<1x8x1xf32>
    %159 = vector.shape_cast %158 : vector<1x8x1xf32> to vector<8x1xf32>
    %160 = vector.extract_strided_slice %140 {offsets = [0, 0, 0], sizes = [2, 1, 8], strides = [1, 1, 1]} : vector<2x8x8xf32> to vector<2x1x8xf32>
    %161 = vector.shape_cast %159 : vector<8x1xf32> to vector<1x8x1xf32>
    %162 = vector.broadcast %161 : vector<1x8x1xf32> to vector<2x8x8xf32>
    %163 = vector.broadcast %160 : vector<2x1x8xf32> to vector<2x8x8xf32>
    %164 = arith.mulf %162, %163 : vector<2x8x8xf32>
    %165 = arith.addf %157, %164 : vector<2x8x8xf32>
    %c3_86 = arith.constant 3 : index
    %c0_87 = arith.constant 0 : index
    %c0_88 = arith.constant 0 : index
    %166 = vector.load %arg4[%c3_86, %c0_87, %c0_88] : memref<24x8x1xf32, #tpu.memory_space<vmem>>, vector<1x8x1xf32>
    %167 = vector.shape_cast %166 : vector<1x8x1xf32> to vector<8x1xf32>
    %168 = vector.extract_strided_slice %138 {offsets = [0, 1, 0], sizes = [2, 1, 8], strides = [1, 1, 1]} : vector<2x8x8xf32> to vector<2x1x8xf32>
    %169 = vector.shape_cast %167 : vector<8x1xf32> to vector<1x8x1xf32>
    %170 = vector.broadcast %169 : vector<1x8x1xf32> to vector<2x8x8xf32>
    %171 = vector.broadcast %168 : vector<2x1x8xf32> to vector<2x8x8xf32>
    %172 = arith.mulf %170, %171 : vector<2x8x8xf32>
    %173 = arith.addf %165, %172 : vector<2x8x8xf32>
    %c4_89 = arith.constant 4 : index
    %c0_90 = arith.constant 0 : index
    %c0_91 = arith.constant 0 : index
    %174 = vector.load %arg4[%c4_89, %c0_90, %c0_91] : memref<24x8x1xf32, #tpu.memory_space<vmem>>, vector<1x8x1xf32>
    %175 = vector.shape_cast %174 : vector<1x8x1xf32> to vector<8x1xf32>
    %176 = vector.extract_strided_slice %139 {offsets = [0, 1, 0], sizes = [2, 1, 8], strides = [1, 1, 1]} : vector<2x8x8xf32> to vector<2x1x8xf32>
    %177 = vector.shape_cast %175 : vector<8x1xf32> to vector<1x8x1xf32>
    %178 = vector.broadcast %177 : vector<1x8x1xf32> to vector<2x8x8xf32>
    %179 = vector.broadcast %176 : vector<2x1x8xf32> to vector<2x8x8xf32>
    %180 = arith.mulf %178, %179 : vector<2x8x8xf32>
    %181 = arith.addf %173, %180 : vector<2x8x8xf32>
    %c5_92 = arith.constant 5 : index
    %c0_93 = arith.constant 0 : index
    %c0_94 = arith.constant 0 : index
    %182 = vector.load %arg4[%c5_92, %c0_93, %c0_94] : memref<24x8x1xf32, #tpu.memory_space<vmem>>, vector<1x8x1xf32>
    %183 = vector.shape_cast %182 : vector<1x8x1xf32> to vector<8x1xf32>
    %184 = vector.extract_strided_slice %140 {offsets = [0, 1, 0], sizes = [2, 1, 8], strides = [1, 1, 1]} : vector<2x8x8xf32> to vector<2x1x8xf32>
    %185 = vector.shape_cast %183 : vector<8x1xf32> to vector<1x8x1xf32>
    %186 = vector.broadcast %185 : vector<1x8x1xf32> to vector<2x8x8xf32>
    %187 = vector.broadcast %184 : vector<2x1x8xf32> to vector<2x8x8xf32>
    %188 = arith.mulf %186, %187 : vector<2x8x8xf32>
    %189 = arith.addf %181, %188 : vector<2x8x8xf32>
    %c6_95 = arith.constant 6 : index
    %c0_96 = arith.constant 0 : index
    %c0_97 = arith.constant 0 : index
    %190 = vector.load %arg4[%c6_95, %c0_96, %c0_97] : memref<24x8x1xf32, #tpu.memory_space<vmem>>, vector<1x8x1xf32>
    %191 = vector.shape_cast %190 : vector<1x8x1xf32> to vector<8x1xf32>
    %192 = vector.extract_strided_slice %138 {offsets = [0, 2, 0], sizes = [2, 1, 8], strides = [1, 1, 1]} : vector<2x8x8xf32> to vector<2x1x8xf32>
    %193 = vector.shape_cast %191 : vector<8x1xf32> to vector<1x8x1xf32>
    %194 = vector.broadcast %193 : vector<1x8x1xf32> to vector<2x8x8xf32>
    %195 = vector.broadcast %192 : vector<2x1x8xf32> to vector<2x8x8xf32>
    %196 = arith.mulf %194, %195 : vector<2x8x8xf32>
    %197 = arith.addf %189, %196 : vector<2x8x8xf32>
    %c7_98 = arith.constant 7 : index
    %c0_99 = arith.constant 0 : index
    %c0_100 = arith.constant 0 : index
    %198 = vector.load %arg4[%c7_98, %c0_99, %c0_100] : memref<24x8x1xf32, #tpu.memory_space<vmem>>, vector<1x8x1xf32>
    %199 = vector.shape_cast %198 : vector<1x8x1xf32> to vector<8x1xf32>
    %200 = vector.extract_strided_slice %139 {offsets = [0, 2, 0], sizes = [2, 1, 8], strides = [1, 1, 1]} : vector<2x8x8xf32> to vector<2x1x8xf32>
    %201 = vector.shape_cast %199 : vector<8x1xf32> to vector<1x8x1xf32>
    %202 = vector.broadcast %201 : vector<1x8x1xf32> to vector<2x8x8xf32>
    %203 = vector.broadcast %200 : vector<2x1x8xf32> to vector<2x8x8xf32>
    %204 = arith.mulf %202, %203 : vector<2x8x8xf32>
    %205 = arith.addf %197, %204 : vector<2x8x8xf32>
    %c8_101 = arith.constant 8 : index
    %c0_102 = arith.constant 0 : index
    %c0_103 = arith.constant 0 : index
    %206 = vector.load %arg4[%c8_101, %c0_102, %c0_103] : memref<24x8x1xf32, #tpu.memory_space<vmem>>, vector<1x8x1xf32>
    %207 = vector.shape_cast %206 : vector<1x8x1xf32> to vector<8x1xf32>
    %208 = vector.extract_strided_slice %140 {offsets = [0, 2, 0], sizes = [2, 1, 8], strides = [1, 1, 1]} : vector<2x8x8xf32> to vector<2x1x8xf32>
    %209 = vector.shape_cast %207 : vector<8x1xf32> to vector<1x8x1xf32>
    %210 = vector.broadcast %209 : vector<1x8x1xf32> to vector<2x8x8xf32>
    %211 = vector.broadcast %208 : vector<2x1x8xf32> to vector<2x8x8xf32>
    %212 = arith.mulf %210, %211 : vector<2x8x8xf32>
    %213 = arith.addf %205, %212 : vector<2x8x8xf32>
    %c9_104 = arith.constant 9 : index
    %c0_105 = arith.constant 0 : index
    %c0_106 = arith.constant 0 : index
    %214 = vector.load %arg4[%c9_104, %c0_105, %c0_106] : memref<24x8x1xf32, #tpu.memory_space<vmem>>, vector<1x8x1xf32>
    %215 = vector.shape_cast %214 : vector<1x8x1xf32> to vector<8x1xf32>
    %216 = vector.extract_strided_slice %138 {offsets = [0, 3, 0], sizes = [2, 1, 8], strides = [1, 1, 1]} : vector<2x8x8xf32> to vector<2x1x8xf32>
    %217 = vector.shape_cast %215 : vector<8x1xf32> to vector<1x8x1xf32>
    %218 = vector.broadcast %217 : vector<1x8x1xf32> to vector<2x8x8xf32>
    %219 = vector.broadcast %216 : vector<2x1x8xf32> to vector<2x8x8xf32>
    %220 = arith.mulf %218, %219 : vector<2x8x8xf32>
    %221 = arith.addf %213, %220 : vector<2x8x8xf32>
    %c10_107 = arith.constant 10 : index
    %c0_108 = arith.constant 0 : index
    %c0_109 = arith.constant 0 : index
    %222 = vector.load %arg4[%c10_107, %c0_108, %c0_109] : memref<24x8x1xf32, #tpu.memory_space<vmem>>, vector<1x8x1xf32>
    %223 = vector.shape_cast %222 : vector<1x8x1xf32> to vector<8x1xf32>
    %224 = vector.extract_strided_slice %139 {offsets = [0, 3, 0], sizes = [2, 1, 8], strides = [1, 1, 1]} : vector<2x8x8xf32> to vector<2x1x8xf32>
    %225 = vector.shape_cast %223 : vector<8x1xf32> to vector<1x8x1xf32>
    %226 = vector.broadcast %225 : vector<1x8x1xf32> to vector<2x8x8xf32>
    %227 = vector.broadcast %224 : vector<2x1x8xf32> to vector<2x8x8xf32>
    %228 = arith.mulf %226, %227 : vector<2x8x8xf32>
    %229 = arith.addf %221, %228 : vector<2x8x8xf32>
    %c11_110 = arith.constant 11 : index
    %c0_111 = arith.constant 0 : index
    %c0_112 = arith.constant 0 : index
    %230 = vector.load %arg4[%c11_110, %c0_111, %c0_112] : memref<24x8x1xf32, #tpu.memory_space<vmem>>, vector<1x8x1xf32>
    %231 = vector.shape_cast %230 : vector<1x8x1xf32> to vector<8x1xf32>
    %232 = vector.extract_strided_slice %140 {offsets = [0, 3, 0], sizes = [2, 1, 8], strides = [1, 1, 1]} : vector<2x8x8xf32> to vector<2x1x8xf32>
    %233 = vector.shape_cast %231 : vector<8x1xf32> to vector<1x8x1xf32>
    %234 = vector.broadcast %233 : vector<1x8x1xf32> to vector<2x8x8xf32>
    %235 = vector.broadcast %232 : vector<2x1x8xf32> to vector<2x8x8xf32>
    %236 = arith.mulf %234, %235 : vector<2x8x8xf32>
    %237 = arith.addf %229, %236 : vector<2x8x8xf32>
    %c12 = arith.constant 12 : index
    %c0_113 = arith.constant 0 : index
    %c0_114 = arith.constant 0 : index
    %238 = vector.load %arg4[%c12, %c0_113, %c0_114] : memref<24x8x1xf32, #tpu.memory_space<vmem>>, vector<1x8x1xf32>
    %239 = vector.shape_cast %238 : vector<1x8x1xf32> to vector<8x1xf32>
    %240 = vector.extract_strided_slice %138 {offsets = [0, 4, 0], sizes = [2, 1, 8], strides = [1, 1, 1]} : vector<2x8x8xf32> to vector<2x1x8xf32>
    %241 = vector.shape_cast %239 : vector<8x1xf32> to vector<1x8x1xf32>
    %242 = vector.broadcast %241 : vector<1x8x1xf32> to vector<2x8x8xf32>
    %243 = vector.broadcast %240 : vector<2x1x8xf32> to vector<2x8x8xf32>
    %244 = arith.mulf %242, %243 : vector<2x8x8xf32>
    %245 = arith.addf %237, %244 : vector<2x8x8xf32>
    %c13 = arith.constant 13 : index
    %c0_115 = arith.constant 0 : index
    %c0_116 = arith.constant 0 : index
    %246 = vector.load %arg4[%c13, %c0_115, %c0_116] : memref<24x8x1xf32, #tpu.memory_space<vmem>>, vector<1x8x1xf32>
    %247 = vector.shape_cast %246 : vector<1x8x1xf32> to vector<8x1xf32>
    %248 = vector.extract_strided_slice %139 {offsets = [0, 4, 0], sizes = [2, 1, 8], strides = [1, 1, 1]} : vector<2x8x8xf32> to vector<2x1x8xf32>
    %249 = vector.shape_cast %247 : vector<8x1xf32> to vector<1x8x1xf32>
    %250 = vector.broadcast %249 : vector<1x8x1xf32> to vector<2x8x8xf32>
    %251 = vector.broadcast %248 : vector<2x1x8xf32> to vector<2x8x8xf32>
    %252 = arith.mulf %250, %251 : vector<2x8x8xf32>
    %253 = arith.addf %245, %252 : vector<2x8x8xf32>
    %c14 = arith.constant 14 : index
    %c0_117 = arith.constant 0 : index
    %c0_118 = arith.constant 0 : index
    %254 = vector.load %arg4[%c14, %c0_117, %c0_118] : memref<24x8x1xf32, #tpu.memory_space<vmem>>, vector<1x8x1xf32>
    %255 = vector.shape_cast %254 : vector<1x8x1xf32> to vector<8x1xf32>
    %256 = vector.extract_strided_slice %140 {offsets = [0, 4, 0], sizes = [2, 1, 8], strides = [1, 1, 1]} : vector<2x8x8xf32> to vector<2x1x8xf32>
    %257 = vector.shape_cast %255 : vector<8x1xf32> to vector<1x8x1xf32>
    %258 = vector.broadcast %257 : vector<1x8x1xf32> to vector<2x8x8xf32>
    %259 = vector.broadcast %256 : vector<2x1x8xf32> to vector<2x8x8xf32>
    %260 = arith.mulf %258, %259 : vector<2x8x8xf32>
    %261 = arith.addf %253, %260 : vector<2x8x8xf32>
    %c15 = arith.constant 15 : index
    %c0_119 = arith.constant 0 : index
    %c0_120 = arith.constant 0 : index
    %262 = vector.load %arg4[%c15, %c0_119, %c0_120] : memref<24x8x1xf32, #tpu.memory_space<vmem>>, vector<1x8x1xf32>
    %263 = vector.shape_cast %262 : vector<1x8x1xf32> to vector<8x1xf32>
    %264 = vector.extract_strided_slice %138 {offsets = [0, 5, 0], sizes = [2, 1, 8], strides = [1, 1, 1]} : vector<2x8x8xf32> to vector<2x1x8xf32>
    %265 = vector.shape_cast %263 : vector<8x1xf32> to vector<1x8x1xf32>
    %266 = vector.broadcast %265 : vector<1x8x1xf32> to vector<2x8x8xf32>
    %267 = vector.broadcast %264 : vector<2x1x8xf32> to vector<2x8x8xf32>
    %268 = arith.mulf %266, %267 : vector<2x8x8xf32>
    %269 = arith.addf %261, %268 : vector<2x8x8xf32>
    %c16 = arith.constant 16 : index
    %c0_121 = arith.constant 0 : index
    %c0_122 = arith.constant 0 : index
    %270 = vector.load %arg4[%c16, %c0_121, %c0_122] : memref<24x8x1xf32, #tpu.memory_space<vmem>>, vector<1x8x1xf32>
    %271 = vector.shape_cast %270 : vector<1x8x1xf32> to vector<8x1xf32>
    %272 = vector.extract_strided_slice %139 {offsets = [0, 5, 0], sizes = [2, 1, 8], strides = [1, 1, 1]} : vector<2x8x8xf32> to vector<2x1x8xf32>
    %273 = vector.shape_cast %271 : vector<8x1xf32> to vector<1x8x1xf32>
    %274 = vector.broadcast %273 : vector<1x8x1xf32> to vector<2x8x8xf32>
    %275 = vector.broadcast %272 : vector<2x1x8xf32> to vector<2x8x8xf32>
    %276 = arith.mulf %274, %275 : vector<2x8x8xf32>
    %277 = arith.addf %269, %276 : vector<2x8x8xf32>
    %c17 = arith.constant 17 : index
    %c0_123 = arith.constant 0 : index
    %c0_124 = arith.constant 0 : index
    %278 = vector.load %arg4[%c17, %c0_123, %c0_124] : memref<24x8x1xf32, #tpu.memory_space<vmem>>, vector<1x8x1xf32>
    %279 = vector.shape_cast %278 : vector<1x8x1xf32> to vector<8x1xf32>
    %280 = vector.extract_strided_slice %140 {offsets = [0, 5, 0], sizes = [2, 1, 8], strides = [1, 1, 1]} : vector<2x8x8xf32> to vector<2x1x8xf32>
    %281 = vector.shape_cast %279 : vector<8x1xf32> to vector<1x8x1xf32>
    %282 = vector.broadcast %281 : vector<1x8x1xf32> to vector<2x8x8xf32>
    %283 = vector.broadcast %280 : vector<2x1x8xf32> to vector<2x8x8xf32>
    %284 = arith.mulf %282, %283 : vector<2x8x8xf32>
    %285 = arith.addf %277, %284 : vector<2x8x8xf32>
    %c18 = arith.constant 18 : index
    %c0_125 = arith.constant 0 : index
    %c0_126 = arith.constant 0 : index
    %286 = vector.load %arg4[%c18, %c0_125, %c0_126] : memref<24x8x1xf32, #tpu.memory_space<vmem>>, vector<1x8x1xf32>
    %287 = vector.shape_cast %286 : vector<1x8x1xf32> to vector<8x1xf32>
    %288 = vector.extract_strided_slice %138 {offsets = [0, 6, 0], sizes = [2, 1, 8], strides = [1, 1, 1]} : vector<2x8x8xf32> to vector<2x1x8xf32>
    %289 = vector.shape_cast %287 : vector<8x1xf32> to vector<1x8x1xf32>
    %290 = vector.broadcast %289 : vector<1x8x1xf32> to vector<2x8x8xf32>
    %291 = vector.broadcast %288 : vector<2x1x8xf32> to vector<2x8x8xf32>
    %292 = arith.mulf %290, %291 : vector<2x8x8xf32>
    %293 = arith.addf %285, %292 : vector<2x8x8xf32>
    %c19 = arith.constant 19 : index
    %c0_127 = arith.constant 0 : index
    %c0_128 = arith.constant 0 : index
    %294 = vector.load %arg4[%c19, %c0_127, %c0_128] : memref<24x8x1xf32, #tpu.memory_space<vmem>>, vector<1x8x1xf32>
    %295 = vector.shape_cast %294 : vector<1x8x1xf32> to vector<8x1xf32>
    %296 = vector.extract_strided_slice %139 {offsets = [0, 6, 0], sizes = [2, 1, 8], strides = [1, 1, 1]} : vector<2x8x8xf32> to vector<2x1x8xf32>
    %297 = vector.shape_cast %295 : vector<8x1xf32> to vector<1x8x1xf32>
    %298 = vector.broadcast %297 : vector<1x8x1xf32> to vector<2x8x8xf32>
    %299 = vector.broadcast %296 : vector<2x1x8xf32> to vector<2x8x8xf32>
    %300 = arith.mulf %298, %299 : vector<2x8x8xf32>
    %301 = arith.addf %293, %300 : vector<2x8x8xf32>
    %c20 = arith.constant 20 : index
    %c0_129 = arith.constant 0 : index
    %c0_130 = arith.constant 0 : index
    %302 = vector.load %arg4[%c20, %c0_129, %c0_130] : memref<24x8x1xf32, #tpu.memory_space<vmem>>, vector<1x8x1xf32>
    %303 = vector.shape_cast %302 : vector<1x8x1xf32> to vector<8x1xf32>
    %304 = vector.extract_strided_slice %140 {offsets = [0, 6, 0], sizes = [2, 1, 8], strides = [1, 1, 1]} : vector<2x8x8xf32> to vector<2x1x8xf32>
    %305 = vector.shape_cast %303 : vector<8x1xf32> to vector<1x8x1xf32>
    %306 = vector.broadcast %305 : vector<1x8x1xf32> to vector<2x8x8xf32>
    %307 = vector.broadcast %304 : vector<2x1x8xf32> to vector<2x8x8xf32>
    %308 = arith.mulf %306, %307 : vector<2x8x8xf32>
    %309 = arith.addf %301, %308 : vector<2x8x8xf32>
    %c21 = arith.constant 21 : index
    %c0_131 = arith.constant 0 : index
    %c0_132 = arith.constant 0 : index
    %310 = vector.load %arg4[%c21, %c0_131, %c0_132] : memref<24x8x1xf32, #tpu.memory_space<vmem>>, vector<1x8x1xf32>
    %311 = vector.shape_cast %310 : vector<1x8x1xf32> to vector<8x1xf32>
    %312 = vector.extract_strided_slice %138 {offsets = [0, 7, 0], sizes = [2, 1, 8], strides = [1, 1, 1]} : vector<2x8x8xf32> to vector<2x1x8xf32>
    %313 = vector.shape_cast %311 : vector<8x1xf32> to vector<1x8x1xf32>
    %314 = vector.broadcast %313 : vector<1x8x1xf32> to vector<2x8x8xf32>
    %315 = vector.broadcast %312 : vector<2x1x8xf32> to vector<2x8x8xf32>
    %316 = arith.mulf %314, %315 : vector<2x8x8xf32>
    %317 = arith.addf %309, %316 : vector<2x8x8xf32>
    %c22 = arith.constant 22 : index
    %c0_133 = arith.constant 0 : index
    %c0_134 = arith.constant 0 : index
    %318 = vector.load %arg4[%c22, %c0_133, %c0_134] : memref<24x8x1xf32, #tpu.memory_space<vmem>>, vector<1x8x1xf32>
    %319 = vector.shape_cast %318 : vector<1x8x1xf32> to vector<8x1xf32>
    %320 = vector.extract_strided_slice %139 {offsets = [0, 7, 0], sizes = [2, 1, 8], strides = [1, 1, 1]} : vector<2x8x8xf32> to vector<2x1x8xf32>
    %321 = vector.shape_cast %319 : vector<8x1xf32> to vector<1x8x1xf32>
    %322 = vector.broadcast %321 : vector<1x8x1xf32> to vector<2x8x8xf32>
    %323 = vector.broadcast %320 : vector<2x1x8xf32> to vector<2x8x8xf32>
    %324 = arith.mulf %322, %323 : vector<2x8x8xf32>
    %325 = arith.addf %317, %324 : vector<2x8x8xf32>
    %c23 = arith.constant 23 : index
    %c0_135 = arith.constant 0 : index
    %c0_136 = arith.constant 0 : index
    %326 = vector.load %arg4[%c23, %c0_135, %c0_136] : memref<24x8x1xf32, #tpu.memory_space<vmem>>, vector<1x8x1xf32>
    %327 = vector.shape_cast %326 : vector<1x8x1xf32> to vector<8x1xf32>
    %328 = vector.extract_strided_slice %140 {offsets = [0, 7, 0], sizes = [2, 1, 8], strides = [1, 1, 1]} : vector<2x8x8xf32> to vector<2x1x8xf32>
    %329 = vector.shape_cast %327 : vector<8x1xf32> to vector<1x8x1xf32>
    %330 = vector.broadcast %329 : vector<1x8x1xf32> to vector<2x8x8xf32>
    %331 = vector.broadcast %328 : vector<2x1x8xf32> to vector<2x8x8xf32>
    %332 = arith.mulf %330, %331 : vector<2x8x8xf32>
    %333 = arith.addf %325, %332 : vector<2x8x8xf32>
    %334 = vector.shape_cast %4 : vector<8x1xf32> to vector<1x8x1xf32>
    %335 = vector.broadcast %334 : vector<1x8x1xf32> to vector<2x8x8xf32>
    %336 = arith.addf %333, %335 : vector<2x8x8xf32>
    %337 = math.absf %336 : vector<2x8x8xf32>
    %cst_137 = arith.constant dense<0.000000e+00> : vector<2x8xf32>
    %338 = vector.multi_reduction <add>, %337, %cst_137 [2] : vector<2x8x8xf32> to vector<2x8xf32>
    %339 = vector.shape_cast %338 : vector<2x8xf32> to vector<2x8x1xf32>
    %cst_138 = arith.constant 1.250000e-01 : f32
    %340 = vector.broadcast %cst_138 : f32 to vector<2x8x1xf32>
    %341 = arith.mulf %339, %340 : vector<2x8x1xf32>
    %c0_139 = arith.constant 0 : index
    %c0_140 = arith.constant 0 : index
    %342 = vector.load %arg5[%c0_139, %c0_140] : memref<8x8xf32, #tpu.memory_space<vmem>>, vector<8x8xf32>
    %343 = vector.shape_cast %342 : vector<8x8xf32> to vector<1x8x8xf32>
    %344 = vector.broadcast %343 : vector<1x8x8xf32> to vector<2x8x8xf32>
    %345 = vector.broadcast %341 : vector<2x8x1xf32> to vector<2x8x8xf32>
    %346 = arith.mulf %344, %345 : vector<2x8x8xf32>
    %cst_141 = arith.constant dense<0.000000e+00> : vector<2x8xf32>
    %347 = vector.multi_reduction <add>, %346, %cst_141 [1] : vector<2x8x8xf32> to vector<2x8xf32>
    %348 = vector.shape_cast %347 : vector<2x8xf32> to vector<2x1x8xf32>
    %349 = vector.shape_cast %6 : vector<1x8xf32> to vector<1x1x8xf32>
    %350 = vector.broadcast %349 : vector<1x1x8xf32> to vector<2x1x8xf32>
    %351 = arith.addf %348, %350 : vector<2x1x8xf32>
    %352 = vector.shape_cast %7 : vector<1x8xf32> to vector<1x1x8xf32>
    %353 = vector.broadcast %352 : vector<1x1x8xf32> to vector<2x1x8xf32>
    %354 = arith.mulf %351, %353 : vector<2x1x8xf32>
    %355 = vector.shape_cast %8 : vector<1x8xf32> to vector<1x1x8xf32>
    %356 = vector.broadcast %355 : vector<1x1x8xf32> to vector<2x1x8xf32>
    %357 = arith.addf %354, %356 : vector<2x1x8xf32>
    %cst_142 = arith.constant 0.000000e+00 : f32
    %358 = vector.broadcast %cst_142 : f32 to vector<2x1x8xf32>
    %359 = arith.maximumf %357, %358 : vector<2x1x8xf32>
    %c0_143 = arith.constant 0 : index
    %c0_144 = arith.constant 0 : index
    %360 = vector.load %arg6[%c0_143, %c0_144] : memref<8x8xf32, #tpu.memory_space<vmem>>, vector<8x8xf32>
    %361 = vector.shape_cast %360 : vector<8x8xf32> to vector<1x8x8xf32>
    %362 = vector.broadcast %361 : vector<1x8x8xf32> to vector<2x8x8xf32>
    %363 = vector.broadcast %359 : vector<2x1x8xf32> to vector<2x8x8xf32>
    %364 = arith.mulf %362, %363 : vector<2x8x8xf32>
    %cst_145 = arith.constant dense<0.000000e+00> : vector<2x8xf32>
    %365 = vector.multi_reduction <add>, %364, %cst_145 [2] : vector<2x8x8xf32> to vector<2x8xf32>
    %366 = vector.shape_cast %365 : vector<2x8xf32> to vector<2x8x1xf32>
    %367 = vector.shape_cast %5 : vector<8x1xf32> to vector<1x8x1xf32>
    %368 = vector.broadcast %367 : vector<1x8x1xf32> to vector<2x8x1xf32>
    %369 = arith.addf %366, %368 : vector<2x8x1xf32>
    %370 = arith.negf %369 : vector<2x8x1xf32>
    %371 = math.exp %370 : vector<2x8x1xf32>
    %cst_146 = arith.constant 1.000000e+00 : f32
    %372 = vector.broadcast %cst_146 : f32 to vector<2x8x1xf32>
    %373 = arith.addf %372, %371 : vector<2x8x1xf32>
    %374 = arith.divf %372, %373 : vector<2x8x1xf32>
    %375 = arith.mulf %341, %374 : vector<2x8x1xf32>
    %cst_147 = arith.constant 0.000000e+00 : f32
    %376 = vector.broadcast %cst_147 : f32 to vector<2x8x1xf32>
    %377 = arith.subf %376, %375 : vector<2x8x1xf32>
    %378 = vector.broadcast %377 : vector<2x8x1xf32> to vector<2x8x8xf32>
    %379 = arith.maximumf %378, %336 : vector<2x8x8xf32>
    %380 = vector.broadcast %375 : vector<2x8x1xf32> to vector<2x8x8xf32>
    %381 = arith.minimumf %380, %379 : vector<2x8x8xf32>
    %382 = arith.subf %336, %381 : vector<2x8x8xf32>
    %383 = vector.extract_strided_slice %382 {offsets = [0, 0, 0], sizes = [2, 4, 8], strides = [1, 1, 1]} : vector<2x8x8xf32> to vector<2x4x8xf32>
    %384 = arith.addf %383, %12 : vector<2x4x8xf32>
    %c0_148 = arith.constant 0 : index
    %c0_149 = arith.constant 0 : index
    %c0_150 = arith.constant 0 : index
    %385 = vector.load %arg9[%c0_148, %c0_149, %c0_150] : memref<2x8x8xf32, #tpu.memory_space<vmem>>, vector<2x4x8xf32>
    tpu.vector_store %arg9[%c0_148, %c0_149, %c0_150], %384 {strides = array<i32>} : memref<2x8x8xf32, #tpu.memory_space<vmem>>, vector<2x4x8xf32>,
    %386 = vector.extract_strided_slice %382 {offsets = [0, 4, 0], sizes = [2, 4, 8], strides = [1, 1, 1]} : vector<2x8x8xf32> to vector<2x4x8xf32>
    %c0_151 = arith.constant 0 : index
    %c4_152 = arith.constant 4 : index
    %c0_153 = arith.constant 0 : index
    %387 = vector.load %arg9[%c0_151, %c4_152, %c0_153] : memref<2x8x8xf32, #tpu.memory_space<vmem>>, vector<2x4x8xf32>
    tpu.vector_store %arg9[%c0_151, %c4_152, %c0_153], %386 {strides = array<i32>} : memref<2x8x8xf32, #tpu.memory_space<vmem>>, vector<2x4x8xf32>,
    return
  }
  func.func @transform_0(%arg0: i32) -> (i32, i32, i32) {
    %c0_i32 = arith.constant 0 : i32
    %c0_i32_0 = arith.constant 0 : i32
    %c0_i32_1 = arith.constant 0 : i32
    return %arg0, %c0_i32, %c0_i32_0 : i32, i32, i32
  }
  func.func @transform_1(%arg0: i32) -> (i32, i32, i32) {
    %c0_i32 = arith.constant 0 : i32
    %c0_i32_0 = arith.constant 0 : i32
    %c0_i32_1 = arith.constant 0 : i32
    return %arg0, %c0_i32, %c0_i32_0 : i32, i32, i32
  }
  func.func @transform_2(%arg0: i32) -> (i32, i32, i32) {
    %c0_i32 = arith.constant 0 : i32
    %c0_i32_0 = arith.constant 0 : i32
    %c0_i32_1 = arith.constant 0 : i32
    %c0_i32_2 = arith.constant 0 : i32
    return %c0_i32, %c0_i32_0, %c0_i32_1 : i32, i32, i32
  }
  func.func @transform_3(%arg0: i32) -> (i32, i32, i32) {
    %c0_i32 = arith.constant 0 : i32
    %c0_i32_0 = arith.constant 0 : i32
    %c0_i32_1 = arith.constant 0 : i32
    %c0_i32_2 = arith.constant 0 : i32
    return %c0_i32, %c0_i32_0, %c0_i32_1 : i32, i32, i32
  }
  func.func @transform_4(%arg0: i32) -> (i32, i32) {
    %c0_i32 = arith.constant 0 : i32
    %c0_i32_0 = arith.constant 0 : i32
    %c0_i32_1 = arith.constant 0 : i32
    return %c0_i32, %c0_i32_0 : i32, i32
  }
  func.func @transform_5(%arg0: i32) -> (i32, i32) {
    %c0_i32 = arith.constant 0 : i32
    %c0_i32_0 = arith.constant 0 : i32
    %c0_i32_1 = arith.constant 0 : i32
    return %c0_i32, %c0_i32_0 : i32, i32
  }
  func.func @transform_6(%arg0: i32) -> (i32, i32) {
    %c0_i32 = arith.constant 0 : i32
    %c0_i32_0 = arith.constant 0 : i32
    %c0_i32_1 = arith.constant 0 : i32
    return %c0_i32, %c0_i32_0 : i32, i32
  }
  func.func @transform_7(%arg0: i32) -> (i32, i32) {
    %c0_i32 = arith.constant 0 : i32
    %c0_i32_0 = arith.constant 0 : i32
    %c0_i32_1 = arith.constant 0 : i32
    return %c0_i32, %c0_i32_0 : i32, i32
  }
  func.func @transform_8(%arg0: i32) -> (i32, i32, i32) {
    %c0_i32 = arith.constant 0 : i32
    %c0_i32_0 = arith.constant 0 : i32
    %c0_i32_1 = arith.constant 0 : i32
    return %arg0, %c0_i32, %c0_i32_0 : i32, i32, i32
  }
}

</mosaic_0001>

<bundles_post_ra>
// kernel: tpu_custom_call.1
= control target key start
LH: loop header
LB: loop body
LE: loop exit
PB: predicated region body
PF: predicated region fallthrough
CT: control target
= control target key end

     0   :  { %v1008_v1 = vmov 0   ;;  %s1489_s0 = inlined_call_operand.vmem [shape: f32[2,4,8], index: 0, kind: input, shape index: {}]   ;;  %s1490_s1 = inlined_call_operand.vmem [shape: f32[2,4,8], index: 1, kind: input, shape index: {}]   ;;  %s1491_s2 = inlined_call_operand.vmem [shape: f32[12,8,1], index: 2, kind: input, shape index: {}]   ;;  %s1492_s3 = inlined_call_operand.vmem [shape: f32[24,8,1], index: 3, kind: input, shape index: {}]   ;;  %s1493_s4 = inlined_call_operand.vmem [shape: f32[8,8], index: 4, kind: input, shape index: {}]   ;;  %s1494_s5 = inlined_call_operand.vmem [shape: f32[8,8], index: 5, kind: input, shape index: {}]   ;;  %s1495_s6 = inlined_call_operand.vmem [shape: f32[8,6], index: 6, kind: input, shape index: {}]   ;;  %s1496_s7 = inlined_call_operand.vmem [shape: f32[3,8], index: 7, kind: input, shape index: {}]   ;;  %s1497_s8 = inlined_call_operand.hbm [shape: f32[2,8,8], index: 8, kind: output, shape index: {}]  }
   0x1   :  { %v30_v0 = vld [vmem:[%s1495_s6] sm:$0xf]  ;;  %965 = vset.pattern.permute.xlu0 %v1008_v1  ;;  %967 = vset.pattern.permute.xlu1 %v1008_v1 }
   0x2   :  { %45 = vperm.xlu0 %965, %v30_v0   ;;  %v79_v2 = vld [vmem:[%s1491_s2] sm:$0xff] }
   0x3   :  { %82 = vperm.xlu1 %967, %v79_v2  }
   0x4   :  { %13 = vsyncpa [#allocation4], 0  ;;  %v1009_v3 = vmov 1   ;;  %v916_v4 = vld [vmem:[%s1491_s2 + $0x8] sm:$0xff]  ;;  %v919_v5 = vld [vmem:[%s1491_s2 + $0x20] sm:$0xff]  ;;  %v1010_v10 = vmov 2   ;;  %v85_v38 = vlaneseq }
   0x5   :  { %v921_v6 = vld [vmem:[%s1491_s2 + $0x30] sm:$0xff]  ;;  %v923_v7 = vld [vmem:[%s1491_s2 + $0x40] sm:$0xff]  ;;  %vm35_vm0 = vcmask 7168   ;;  %vm38_vm1 = vcmask 80968   ;;  %v1011_v11 = vmov 0.0   ;;  %v918_v29 = vld [vmem:[%s1491_s2 + $0x18] sm:$0xff] }
   0x6   :  { %966 = vset.pattern.permute.xlu0 %v1009_v3  ;;  %v925_v8 = vld [vmem:[%s1491_s2 + $0x50] sm:$0xff]  ;;  %v1093_v9 = vld [vmem:[%s1495_s6] sm:$0xff]  ;;  %36 = vst.msk [vmem:[#allocation2] sm:$0xff] %vm35_vm0, %v1011_v11  ;;  %37 = vst.msk [vmem:[#allocation2 + $0x8] sm:$0xff] %vm35_vm0, %v1011_v11  ;;  %v1013_v34 = vmov 3   ;;  %vm74_vm2 = vcmask 68616  }
   0x7   :  { %51 = vperm.xlu0 %966, %v30_v0   ;;  %39 = vst.msk [vmem:[#allocation2] sm:$0xff] %vm38_vm1, %v1011_v11  ;;  %40 = vst.msk [vmem:[#allocation2 + $0x8] sm:$0xff] %vm38_vm1, %v1011_v11  ;;  %v1100_v13 = vld [vmem:[%s1489_s0] sm:$0xf]  ;;  %v1105_v14 = vld [vmem:[%s1489_s0 + $0x4] sm:$0xf] }
   0x8   :  { %v58_v15 = vld [vmem:[%s1490_s1] sm:$0xf]  ;;  %v59_v16 = vld [vmem:[%s1490_s1 + $0x4] sm:$0xf]  ;;  %s1012_s0 = smov 1   ;;  %v917_v28 = vld [vmem:[%s1491_s2 + $0x10] sm:$0xff] }
   0x9   :  { %v920_v30 = vld [vmem:[%s1491_s2 + $0x28] sm:$0xff]  ;;  %v922_v31 = vld [vmem:[%s1491_s2 + $0x38] sm:$0xff]  ;;  %v1146_v40 = vshrl.u32 %v85_v38, 7  ;;  %vm329_vm3 = vcmask 72712   ;;  %s1016_s13 = smov 126   ;;  %vm797_vm4 = vcmask 64512  }
   0xa   :  { %v924_v32 = vld [vmem:[%s1491_s2 + $0x48] sm:$0xff]  ;;  %v926_v33 = vld [vmem:[%s1491_s2 + $0x58] sm:$0xff]  ;;  %vm897_vm5 = vcmask 64516   ;;  %vm894_vm6 = vcmask 60416  }
   0xb   :  { %968 = vset.pattern.permute.xlu0 %v1008_v1  ;;  %v927_v35 = vld [vmem:[%s1492_s3 + $0x8] sm:$0xff]  ;;  %v1155_v44 = vsub.s32 0, %v1146_v40  ;;  %v1172_v58 = vsub.s32 1, %v1146_v40  ;;  %v1202_v38 = vsub.s32 3, %v1146_v40 }
   0xc   :  { %101 = vperm.xlu0 %968, %v916_v4  }
  0x10   :  { %158 = vperm.xlu0 %968, %v919_v5  }
  0x14   :  { %196 = vperm.xlu0 %968, %v921_v6  }
  0x18   :  { %234 = vperm.xlu0 %968, %v923_v7  }
  0x1c   :  { %272 = vperm.xlu0 %968, %v925_v8   ;;  %v1183_v8 = vsub.s32 2, %v1146_v40 }
  0x20   :  { %969 = vset.pattern.permute.xlu0 %v1010_v10 }
  0x21   :  { %308 = vperm.xlu0 %969, %v1093_v9  }
  0x25   :  { %972 = vset.pattern.permute.xlu0 %v1008_v1 }
  0x81   :  { %v46_v12 = vpop.permute.xlu0 %45 }
  0x82   :  { %v48_v17 = vmul.f32 %v46_v12, %v1100_v13  ;;  %v49_v18 = vmul.f32 %v46_v12, %v1105_v14  ;;  %v60_v19 = vmul.f32 %v58_v15, %v46_v12  ;;  %v61_v21 = vmul.f32 %v59_v16, %v46_v12  ;;  %v83_v36 = vpop.permute.xlu1 %82 }
  0x86   :  { %v52_v20 = vpop.permute.xlu0 %51 }
  0x87   :  { %v54_v22 = vadd.f32 %v52_v20, %v48_v17  ;;  %v55_v23 = vadd.f32 %v52_v20, %v49_v18  ;;  %v62_v24 = vadd.f32 %v60_v19, %v52_v20  ;;  %v63_v25 = vadd.f32 %v61_v21, %v52_v20 }
  0x89   :  { %v1115_v26 = vmax.f32 %v62_v24, 0.0  ;;  %v1119_v27 = vmax.f32 %v63_v25, 0.0  ;;  %v1150_v42 = vmax.f32 %v54_v22, 0.0  ;;  %v1152_v43 = vmax.f32 %v55_v23, 0.0 }
  0x8b   :  { %68 = vrot.lane.b32.xlu1 %v1115_v26, %s1012_s0  ;;  %v102_v46 = vpop.permute.xlu0 %101  ;;  %v107_v49 = vrot.slane %v1150_v42, %v1155_v44  ;;  %v111_v50 = vrot.slane %v1152_v43, %v1155_v44  ;;  %v130_v56 = vrot.slane %v1119_v27, %v1155_v44  ;;  %v126_v57 = vrot.slane %v1115_v26, %v1155_v44 }
  0x8c   :  { %v164_v4 = vrot.slane %v1150_v42, %v1172_v58  ;;  %v168_v5 = vrot.slane %v1152_v43, %v1172_v58  ;;  %v187_v16 = vrot.slane %v1119_v27, %v1172_v58  ;;  %v183_v17 = vrot.slane %v1115_v26, %v1172_v58 }
  0x8d   :  { %v112_v54 = vmul.f32 %v107_v49, %v102_v46  ;;  %v113_v55 = vmul.f32 %v111_v50, %v102_v46 }
  0x8f   :  { %70 = vrot.lane.b32.xlu1 %v1119_v27, %s1012_s0  ;;  %v159_v53 = vpop.permute.xlu0 %158 }
  0x90   :  { %v169_v12 = vmul.f32 %v164_v4, %v159_v53  ;;  %v170_v15 = vmul.f32 %v168_v5, %v159_v53 }
  0x93   :  { %120 = vperm.xlu1 %967, %v917_v28   ;;  %v197_v6 = vpop.permute.xlu0 %196 }
  0x97   :  { %139 = vperm.xlu1 %967, %v918_v29   ;;  %v235_v29 = vpop.permute.xlu0 %234 }
  0x9b   :  { %177 = vperm.xlu1 %967, %v920_v30   ;;  %v221_v30 = vrot.slane %v1150_v42, %v1183_v8 }
  0x9f   :  { %215 = vperm.xlu1 %967, %v922_v31   ;;  %v225_v31 = vrot.slane %v1152_v43, %v1183_v8 }
  0xa3   :  { %253 = vperm.xlu1 %967, %v924_v32  }
  0xa7   :  { %291 = vperm.xlu1 %967, %v926_v33  }
  0xab   :  { %970 = vset.pattern.permute.xlu1 %v1013_v34 }
  0xac   :  { %314 = vperm.xlu1 %970, %v1093_v9  }
  0xb0   :  { %971 = vset.pattern.permute.xlu1 %v1008_v1 }
  0xb1   :  { %356 = vperm.xlu1 %971, %v927_v35  }
  0xfd   :  { %v69_v37 = vpop.permute.xlu1 %68 }
  0xfe   :  { %75 = vst.msk [vmem:[#allocation2] sm:$0xf] %vm74_vm2, %v69_v37  ;;  %v244_v37 = vrot.slane %v1119_v27, %v1183_v8 }
 0x101   :  { %v71_v39 = vpop.permute.xlu1 %70 }
 0x102   :  { %76 = vst.msk [vmem:[#allocation2 + $0x8] sm:$0xf] %vm74_vm2, %v71_v39 }
 0x105   :  { %v1148_v41 = vld [vmem:[#allocation2] sm:$0xf] }
 0x106   :  { %v88_v47 = vrot.slane %v1148_v41, %v1155_v44  ;;  %v145_v2 = vrot.slane %v1148_v41, %v1172_v58  ;;  %v202_v20 = vrot.slane %v1148_v41, %v1183_v8 }
 0x108   :  { %v93_v51 = vmul.f32 %v88_v47, %v83_v36  ;;  %v207_v34 = vmul.f32 %v202_v20, %v197_v6 }
 0x109   :  { %v1157_v45 = vld [vmem:[#allocation2 + $0x8] sm:$0xf] }
 0x10a   :  { %v92_v48 = vrot.slane %v1157_v45, %v1155_v44  ;;  %v114_v60 = vadd.f32 %v112_v54, %v93_v51  ;;  %v149_v3 = vrot.slane %v1157_v45, %v1172_v58  ;;  %v206_v21 = vrot.slane %v1157_v45, %v1183_v8 }
 0x10b   :  { %v246_v51 = vmul.f32 %v244_v37, %v235_v29  ;;  %v259_v54 = vrot.slane %v1148_v41, %v1202_v38  ;;  %v297_v41 = vrot.slane %v1115_v26, %v1202_v38  ;;  %v949_v37 = vld [vmem:[%s1492_s3 + $0xb8] sm:$0xff] }
 0x10c   :  { %v94_v52 = vmul.f32 %v92_v48, %v83_v36  ;;  %v208_v35 = vmul.f32 %v206_v21, %v197_v6  ;;  %v240_v36 = vrot.slane %v1115_v26, %v1183_v8  ;;  %v928_v26 = vld [vmem:[%s1492_s3 + $0x10] sm:$0xff]  ;;  %v930_v21 = vld [vmem:[%s1492_s3 + $0x20] sm:$0xff] }
 0x10e   :  { %v115_v61 = vadd.f32 %v113_v55, %v94_v52  ;;  %v245_v50 = vmul.f32 %v240_v36, %v235_v29  ;;  %v263_v55 = vrot.slane %v1157_v45, %v1202_v38  ;;  %v937_v29 = vld [vmem:[%s1492_s3 + $0x58] sm:$0xff]  ;;  %v334_v36 = vld [vmem:[%s1492_s3] sm:$0xff] }
 0x112   :  { %v121_v59 = vpop.permute.xlu1 %120 }
 0x113   :  { %v131_v62 = vmul.f32 %v126_v57, %v121_v59  ;;  %v132_v63 = vmul.f32 %v130_v56, %v121_v59  ;;  %v278_v56 = vrot.slane %v1150_v42, %v1202_v38  ;;  %v282_v57 = vrot.slane %v1152_v43, %v1202_v38  ;;  %v273_v59 = vpop.permute.xlu0 %272 }
 0x115   :  { %v133_v0 = vadd.f32 %v131_v62, %v114_v60  ;;  %v134_v1 = vadd.f32 %v132_v63, %v115_v61  ;;  %v284_v45 = vmul.f32 %v282_v57, %v273_v59 }
 0x116   :  { %v140_v7 = vpop.permute.xlu1 %139 }
 0x117   :  { %v150_v10 = vmul.f32 %v145_v2, %v140_v7  ;;  %v151_v11 = vmul.f32 %v149_v3, %v140_v7  ;;  %v283_v2 = vmul.f32 %v278_v56, %v273_v59 }
 0x119   :  { %v152_v18 = vadd.f32 %v150_v10, %v133_v0  ;;  %v153_v19 = vadd.f32 %v151_v11, %v134_v1  ;;  %v301_v1 = vrot.slane %v1119_v27, %v1202_v38  ;;  %v309_v10 = vpop.permute.xlu0 %308 }
 0x11a   :  { %v178_v22 = vpop.permute.xlu1 %177 }
 0x11b   :  { %v171_v23 = vadd.f32 %v169_v12, %v152_v18  ;;  %v172_v24 = vadd.f32 %v170_v15, %v153_v19  ;;  %v188_v25 = vmul.f32 %v183_v17, %v178_v22  ;;  %v189_v28 = vmul.f32 %v187_v16, %v178_v22  ;;  %v933_v22 = vld [vmem:[%s1492_s3 + $0x38] sm:$0xff] }
 0x11d   :  { %v190_v32 = vadd.f32 %v188_v25, %v171_v23  ;;  %v191_v33 = vadd.f32 %v189_v28, %v172_v24  ;;  %v931_v23 = vld [vmem:[%s1492_s3 + $0x28] sm:$0xff]  ;;  %v936_v24 = vld [vmem:[%s1492_s3 + $0x50] sm:$0xff]  ;;  %v934_v25 = vld [vmem:[%s1492_s3 + $0x40] sm:$0xff] }
 0x11e   :  { %v216_v39 = vpop.permute.xlu1 %215  ;;  %v939_v28 = vld [vmem:[%s1492_s3 + $0x68] sm:$0xff] }
 0x11f   :  { %v209_v46 = vadd.f32 %v207_v34, %v190_v32  ;;  %v210_v47 = vadd.f32 %v208_v35, %v191_v33  ;;  %v226_v48 = vmul.f32 %v221_v30, %v216_v39  ;;  %v227_v49 = vmul.f32 %v225_v31, %v216_v39  ;;  %v942_v30 = vld [vmem:[%s1492_s3 + $0x80] sm:$0xff]  ;;  %v940_v31 = vld [vmem:[%s1492_s3 + $0x70] sm:$0xff]  ;;  %v945_v32 = vld [vmem:[%s1492_s3 + $0x98] sm:$0xff] }
 0x120   :  { %v943_v33 = vld [vmem:[%s1492_s3 + $0x88] sm:$0xff]  ;;  %v948_v34 = vld [vmem:[%s1492_s3 + $0xb0] sm:$0xff]  ;;  %v946_v35 = vld [vmem:[%s1492_s3 + $0xa0] sm:$0xff] }
 0x121   :  { %v228_v52 = vadd.f32 %v226_v48, %v209_v46  ;;  %v229_v53 = vadd.f32 %v227_v49, %v210_v47  ;;  %v932_v39 = vld [vmem:[%s1492_s3 + $0x30] sm:$0xff]  ;;  %v929_v46 = vld [vmem:[%s1492_s3 + $0x18] sm:$0xff]  ;;  %v938_v47 = vld [vmem:[%s1492_s3 + $0x60] sm:$0xff] }
 0x122   :  { %v254_v60 = vpop.permute.xlu1 %253  ;;  %v935_v48 = vld [vmem:[%s1492_s3 + $0x48] sm:$0xff]  ;;  %v944_v49 = vld [vmem:[%s1492_s3 + $0x90] sm:$0xff] }
 0x123   :  { %v247_v61 = vadd.f32 %v245_v50, %v228_v52  ;;  %v248_v62 = vadd.f32 %v246_v51, %v229_v53  ;;  %v264_v63 = vmul.f32 %v259_v54, %v254_v60  ;;  %v265_v0 = vmul.f32 %v263_v55, %v254_v60  ;;  %v941_v50 = vld [vmem:[%s1492_s3 + $0x78] sm:$0xff]  ;;  %v947_v51 = vld [vmem:[%s1492_s3 + $0xa8] sm:$0xff]  ;;  %s1015_s3 = smov 127  }
 0x124   :  { %v1014_v52 = vmov 4  }
 0x125   :  { %v266_v3 = vadd.f32 %v264_v63, %v247_v61  ;;  %v267_v4 = vadd.f32 %v265_v0, %v248_v62 }
 0x126   :  { %v292_v42 = vpop.permute.xlu1 %291 }
 0x127   :  { %v302_v5 = vmul.f32 %v297_v41, %v292_v42  ;;  %v303_v6 = vmul.f32 %v301_v1, %v292_v42  ;;  %v285_v43 = vadd.f32 %v283_v2, %v266_v3  ;;  %v286_v7 = vadd.f32 %v284_v45, %v267_v4 }
 0x129   :  { %v304_v11 = vadd.f32 %v302_v5, %v285_v43  ;;  %v305_v12 = vadd.f32 %v303_v6, %v286_v7 }
 0x12b   :  { %v311_v15 = vmul.f32 %v309_v10, %v304_v11  ;;  %v312_v16 = vmul.f32 %v309_v10, %v305_v12  ;;  %v315_v17 = vpop.permute.xlu1 %314 }
 0x12d   :  { %v317_v18 = vadd.f32 %v315_v17, %v311_v15  ;;  %v318_v27 = vadd.f32 %v315_v17, %v312_v16 }
 0x12f   :  { %v319_v19 = vmax.f32 %v317_v18, 0.0  ;;  %v320_v20 = vmax.f32 %v318_v27, 0.0 }
 0x130   :  { %v357_v53 = vpop.permute.xlu1 %356 }
 0x131   :  { %325 = vrot.lane.b32.xlu0 %v320_v20, %s1012_s0  ;;  %323 = vrot.lane.b32.xlu1 %v319_v19, %s1012_s0 }
 0x135   :  { %375 = vperm.xlu0 %972, %v928_v26   ;;  %413 = vperm.xlu1 %971, %v930_v21   ;;  %v570_v26 = vsub.s32 4, %v1146_v40 }
 0x139   :  { %470 = vperm.xlu0 %972, %v933_v22   ;;  %432 = vperm.xlu1 %971, %v931_v23  }
 0x13d   :  { %527 = vperm.xlu0 %972, %v936_v24   ;;  %489 = vperm.xlu1 %971, %v934_v25  }
 0x141   :  { %584 = vperm.xlu0 %972, %v939_v28   ;;  %546 = vperm.xlu1 %971, %v937_v29  }
 0x145   :  { %641 = vperm.xlu0 %972, %v942_v30   ;;  %603 = vperm.xlu1 %971, %v940_v31   ;;  %v627_v30 = vsub.s32 5, %v1146_v40 }
 0x149   :  { %698 = vperm.xlu0 %972, %v945_v32   ;;  %660 = vperm.xlu1 %971, %v943_v33  }
 0x14d   :  { %755 = vperm.xlu0 %972, %v948_v34   ;;  %717 = vperm.xlu1 %971, %v946_v35  }
 0x151   :  { %337 = vperm.xlu0 %972, %v334_v36   ;;  %774 = vperm.xlu1 %971, %v949_v37  }
 0x155   :  { %451 = vperm.xlu0 %972, %v932_v39   ;;  %394 = vperm.xlu1 %971, %v929_v46   ;;  %v684_v46 = vsub.s32 6, %v1146_v40 }
 0x159   :  { %565 = vperm.xlu0 %972, %v938_v47   ;;  %508 = vperm.xlu1 %971, %v935_v48  }
 0x15d   :  { %679 = vperm.xlu0 %972, %v944_v49   ;;  %622 = vperm.xlu1 %971, %v941_v50  }
 0x161   :  { %736 = vperm.xlu1 %971, %v947_v51   ;;  %973 = vset.pattern.permute.xlu0 %v1014_v52 }
 0x1a3   :  { %v326_v54 = vpop.permute.xlu0 %325  ;;  %v324_v55 = vpop.permute.xlu1 %323 }
 0x1a4   :  { %331 = vst.msk [vmem:[#allocation2 + $0x8] sm:$0xff] %vm329_vm3, %v326_v54  ;;  %330 = vst.msk [vmem:[#allocation2] sm:$0xff] %vm329_vm3, %v324_v55  ;;  %v741_v55 = vsub.s32 7, %v1146_v40 }
 0x1ab   :  { %v1287_v56 = vld [vmem:[#allocation2 + $0x8] sm:$0xff]  ;;  %v1289_v57 = vld [vmem:[#allocation2] sm:$0xff] }
 0x1ac   :  { %v1293_v59 = vrot.slane %v1287_v56, %v1155_v44  ;;  %v1297_v60 = vrot.slane %v1289_v57, %v1155_v44  ;;  %v1307_v2 = vrot.slane %v1289_v57, %v1172_v58  ;;  %v1311_v45 = vrot.slane %v1287_v56, %v1172_v58 }
 0x1ad   :  { %v1323_v43 = vrot.slane %v1287_v56, %v1183_v8  ;;  %v1327_v7 = vrot.slane %v1289_v57, %v1183_v8  ;;  %v1339_v8 = vrot.slane %v1287_v56, %v1202_v38  ;;  %v1343_v18 = vrot.slane %v1289_v57, %v1202_v38 }
 0x1ae   :  { %v360_v61 = vmul.f32 %v357_v53, %v1293_v59  ;;  %v359_v62 = vmul.f32 %v357_v53, %v1297_v60  ;;  %v1355_v23 = vrot.slane %v1287_v56, %v570_v26  ;;  %v1358_v24 = vrot.slane %v1289_v57, %v570_v26 }
 0x1af   :  { %v1370_v34 = vrot.slane %v1287_v56, %v627_v30  ;;  %v1373_v35 = vrot.slane %v1289_v57, %v627_v30  ;;  %v1385_v50 = vrot.slane %v1287_v56, %v684_v46  ;;  %v1388_v51 = vrot.slane %v1289_v57, %v684_v46 }
 0x1b0   :  { %365 = vrot.lane.b32.xlu1 %v360_v61, %s1015_s3  ;;  %363 = vrot.lane.b32.xlu0 %v359_v62, %s1015_s3  ;;  %v1406_v40 = vrot.slane %v1287_v56, %v741_v55 }
 0x1b4   :  { %v376_v63 = vpop.permute.xlu0 %375  ;;  %v414_v0 = vpop.permute.xlu1 %413 }
 0x1b5   :  { %v378_v1 = vmul.f32 %v376_v63, %v1297_v60  ;;  %v379_v41 = vmul.f32 %v376_v63, %v1293_v59  ;;  %v416_v3 = vmul.f32 %v414_v0, %v1307_v2  ;;  %v417_v4 = vmul.f32 %v414_v0, %v1311_v45 }
 0x1b6   :  { %v1400_v0 = vrot.slane %v1289_v57, %v741_v55 }
 0x1b7   :  { %382 = vrot.lane.b32.xlu1 %v378_v1, %s1016_s13  ;;  %384 = vrot.lane.b32.xlu0 %v379_v41, %s1016_s13 }
 0x1b8   :  { %v433_v42 = vpop.permute.xlu1 %432  ;;  %v471_v58 = vpop.permute.xlu0 %470 }
 0x1b9   :  { %v435_v5 = vmul.f32 %v433_v42, %v1307_v2  ;;  %v436_v6 = vmul.f32 %v433_v42, %v1311_v45  ;;  %v473_v10 = vmul.f32 %v471_v58, %v1327_v7  ;;  %v474_v11 = vmul.f32 %v471_v58, %v1323_v43 }
 0x1bb   :  { %422 = vrot.lane.b32.xlu0 %v417_v4, %s1015_s3  ;;  %420 = vrot.lane.b32.xlu1 %v416_v3, %s1015_s3 }
 0x1bc   :  { %v490_v12 = vpop.permute.xlu1 %489  ;;  %v528_v17 = vpop.permute.xlu0 %527 }
 0x1bd   :  { %v492_v15 = vmul.f32 %v490_v12, %v1327_v7  ;;  %v493_v16 = vmul.f32 %v490_v12, %v1323_v43  ;;  %v530_v27 = vmul.f32 %v528_v17, %v1343_v18  ;;  %v531_v19 = vmul.f32 %v528_v17, %v1339_v8 }
 0x1bf   :  { %441 = vrot.lane.b32.xlu1 %v436_v6, %s1016_s13  ;;  %439 = vrot.lane.b32.xlu0 %v435_v5, %s1016_s13 }
 0x1c0   :  { %v547_v20 = vpop.permute.xlu1 %546  ;;  %v585_v22 = vpop.permute.xlu0 %584 }
 0x1c1   :  { %v549_v21 = vmul.f32 %v547_v20, %v1343_v18  ;;  %v550_v38 = vmul.f32 %v547_v20, %v1339_v8  ;;  %v587_v25 = vmul.f32 %v585_v22, %v1358_v24  ;;  %v588_v28 = vmul.f32 %v585_v22, %v1355_v23 }
 0x1c3   :  { %479 = vrot.lane.b32.xlu1 %v474_v11, %s1015_s3  ;;  %477 = vrot.lane.b32.xlu0 %v473_v10, %s1015_s3 }
 0x1c4   :  { %v604_v29 = vpop.permute.xlu1 %603  ;;  %v642_v33 = vpop.permute.xlu0 %641 }
 0x1c5   :  { %v606_v31 = vmul.f32 %v604_v29, %v1358_v24  ;;  %v607_v32 = vmul.f32 %v604_v29, %v1355_v23  ;;  %v644_v36 = vmul.f32 %v642_v33, %v1373_v35  ;;  %v645_v37 = vmul.f32 %v642_v33, %v1370_v34 }
 0x1c7   :  { %498 = vrot.lane.b32.xlu0 %v493_v16, %s1016_s13  ;;  %496 = vrot.lane.b32.xlu1 %v492_v15, %s1016_s13 }
 0x1c8   :  { %v661_v39 = vpop.permute.xlu1 %660  ;;  %v699_v49 = vpop.permute.xlu0 %698 }
 0x1c9   :  { %v663_v47 = vmul.f32 %v661_v39, %v1373_v35  ;;  %v664_v48 = vmul.f32 %v661_v39, %v1370_v34  ;;  %v701_v52 = vmul.f32 %v699_v49, %v1388_v51  ;;  %v702_v53 = vmul.f32 %v699_v49, %v1385_v50 }
 0x1cb   :  { %536 = vrot.lane.b32.xlu0 %v531_v19, %s1015_s3  ;;  %534 = vrot.lane.b32.xlu1 %v530_v27, %s1015_s3 }
 0x1cc   :  { %v718_v54 = vpop.permute.xlu1 %717  ;;  %v756_v63 = vpop.permute.xlu0 %755 }
 0x1cd   :  { %v720_v61 = vmul.f32 %v718_v54, %v1388_v51  ;;  %v721_v62 = vmul.f32 %v718_v54, %v1385_v50  ;;  %v758_v1 = vmul.f32 %v756_v63, %v1400_v0  ;;  %v759_v3 = vmul.f32 %v756_v63, %v1406_v40 }
 0x1cf   :  { %555 = vrot.lane.b32.xlu1 %v550_v38, %s1016_s13  ;;  %553 = vrot.lane.b32.xlu0 %v549_v21, %s1016_s13 }
 0x1d0   :  { %v775_v41 = vpop.permute.xlu1 %774  ;;  %v338_v42 = vpop.permute.xlu0 %337 }
 0x1d1   :  { %v777_v4 = vmul.f32 %v775_v41, %v1400_v0  ;;  %v778_v57 = vmul.f32 %v775_v41, %v1406_v40  ;;  %v348_v17 = vmul.f32 %v1297_v60, %v338_v42  ;;  %v349_v27 = vmul.f32 %v1293_v59, %v338_v42 }
 0x1d3   :  { %593 = vrot.lane.b32.xlu1 %v588_v28, %s1015_s3  ;;  %591 = vrot.lane.b32.xlu0 %v587_v25, %s1015_s3 }
 0x1d4   :  { %v395_v5 = vpop.permute.xlu1 %394  ;;  %v452_v56 = vpop.permute.xlu0 %451 }
 0x1d5   :  { %v405_v38 = vmul.f32 %v1307_v2, %v395_v5  ;;  %v406_v22 = vmul.f32 %v1311_v45, %v395_v5  ;;  %v462_v59 = vmul.f32 %v1327_v7, %v452_v56  ;;  %v463_v39 = vmul.f32 %v1323_v43, %v452_v56 }
 0x1d7   :  { %612 = vrot.lane.b32.xlu0 %v607_v32, %s1016_s13  ;;  %610 = vrot.lane.b32.xlu1 %v606_v31, %s1016_s13 }
 0x1d8   :  { %v509_v6 = vpop.permute.xlu1 %508  ;;  %v566_v58 = vpop.permute.xlu0 %565 }
 0x1d9   :  { %v576_v56 = vmul.f32 %v1358_v24, %v566_v58 }
 0x1db   :  { %650 = vrot.lane.b32.xlu0 %v645_v37, %s1015_s3  ;;  %648 = vrot.lane.b32.xlu1 %v644_v36, %s1015_s3 }
 0x1dc   :  { %v623_v10 = vpop.permute.xlu1 %622  ;;  %v1416_v11 = vpop.permute.xlu0 %679 }
 0x1df   :  { %669 = vrot.lane.b32.xlu1 %v664_v48, %s1016_s13  ;;  %667 = vrot.lane.b32.xlu0 %v663_v47, %s1016_s13 }
 0x1e0   :  { %v1418_v12 = vpop.permute.xlu1 %736 }
 0x1e3   :  { %707 = vrot.lane.b32.xlu1 %v702_v53, %s1015_s3  ;;  %705 = vrot.lane.b32.xlu0 %v701_v52, %s1015_s3 }
 0x1e7   :  { %726 = vrot.lane.b32.xlu1 %v721_v62, %s1016_s13  ;;  %724 = vrot.lane.b32.xlu0 %v720_v61, %s1016_s13  ;;  %v519_v61 = vmul.f32 %v1343_v18, %v509_v6  ;;  %v520_v62 = vmul.f32 %v1339_v8, %v509_v6 }
 0x1eb   :  { %762 = vrot.lane.b32.xlu1 %v758_v1, %s1015_s3  ;;  %790 = vperm.xlu0 %973, %v1093_v9  }
 0x1ef   :  { %764 = vrot.lane.b32.xlu1 %v759_v3, %s1015_s3  ;;  %781 = vrot.lane.b32.xlu0 %v777_v4, %s1016_s13 }
 0x1f3   :  { %783 = vrot.lane.b32.xlu1 %v778_v57, %s1016_s13 }
 0x222   :  { %v364_v15 = vpop.permute.xlu0 %363  ;;  %v366_v16 = vpop.permute.xlu1 %365 }
 0x223   :  { %v369_v19 = vadd.f32 %v364_v15, %v348_v17  ;;  %v370_v20 = vadd.f32 %v366_v16, %v349_v27  ;;  %v577_v15 = vmul.f32 %v1355_v23, %v566_v58 }
 0x229   :  { %v385_v26 = vpop.permute.xlu0 %384  ;;  %v383_v21 = vpop.permute.xlu1 %382 }
 0x22a   :  { %v389_v25 = vadd.f32 %v385_v26, %v370_v20  ;;  %v388_v28 = vadd.f32 %v383_v21, %v369_v19 }
 0x22c   :  { %v408_v29 = vadd.f32 %v406_v22, %v389_v25  ;;  %v407_v30 = vadd.f32 %v405_v38, %v388_v28  ;;  %v633_v38 = vmul.f32 %v1373_v35, %v623_v10  ;;  %v634_v22 = vmul.f32 %v1370_v34, %v623_v10 }
 0x22d   :  { %v423_v31 = vpop.permute.xlu0 %422  ;;  %v421_v32 = vpop.permute.xlu1 %420 }
 0x22e   :  { %v427_v33 = vadd.f32 %v423_v31, %v408_v29  ;;  %v426_v36 = vadd.f32 %v421_v32, %v407_v30 }
 0x231   :  { %v440_v37 = vpop.permute.xlu0 %439  ;;  %v442_v60 = vpop.permute.xlu1 %441 }
 0x232   :  { %v445_v46 = vadd.f32 %v440_v37, %v426_v36  ;;  %v446_v47 = vadd.f32 %v442_v60, %v427_v33  ;;  %v690_v36 = vmul.f32 %v1388_v51, %v1416_v11  ;;  %v691_v37 = vmul.f32 %v1385_v50, %v1416_v11 }
 0x234   :  { %v464_v48 = vadd.f32 %v462_v59, %v445_v46  ;;  %v465_v2 = vadd.f32 %v463_v39, %v446_v47 }
 0x235   :  { %v478_v49 = vpop.permute.xlu0 %477  ;;  %v480_v45 = vpop.permute.xlu1 %479 }
 0x236   :  { %v483_v52 = vadd.f32 %v478_v49, %v464_v48  ;;  %v484_v53 = vadd.f32 %v480_v45, %v465_v2  ;;  %v747_v49 = vmul.f32 %v1400_v0, %v1418_v12  ;;  %v748_v45 = vmul.f32 %v1406_v40, %v1418_v12 }
 0x239   :  { %v499_v54 = vpop.permute.xlu0 %498  ;;  %v497_v55 = vpop.permute.xlu1 %496 }
 0x23a   :  { %v503_v63 = vadd.f32 %v499_v54, %v484_v53  ;;  %v502_v1 = vadd.f32 %v497_v55, %v483_v52 }
 0x23c   :  { %v522_v41 = vadd.f32 %v520_v62, %v503_v63  ;;  %v521_v7 = vadd.f32 %v519_v61, %v502_v1 }
 0x23d   :  { %v537_v3 = vpop.permute.xlu0 %536  ;;  %v535_v43 = vpop.permute.xlu1 %534 }
 0x23e   :  { %v541_v4 = vadd.f32 %v537_v3, %v522_v41  ;;  %v540_v57 = vadd.f32 %v535_v43, %v521_v7 }
 0x241   :  { %v554_v42 = vpop.permute.xlu0 %553  ;;  %v556_v5 = vpop.permute.xlu1 %555 }
 0x242   :  { %v559_v16 = vadd.f32 %v554_v42, %v540_v57  ;;  %v560_v17 = vadd.f32 %v556_v5, %v541_v4  ;;  %v806_v57 = vld [vmem:[%s1493_s4] sm:$0xff] }
 0x244   :  { %v578_v27 = vadd.f32 %v576_v56, %v559_v16  ;;  %v579_v18 = vadd.f32 %v577_v15, %v560_v17 }
 0x245   :  { %v592_v19 = vpop.permute.xlu0 %591  ;;  %v594_v8 = vpop.permute.xlu1 %593 }
 0x246   :  { %v597_v6 = vadd.f32 %v592_v19, %v578_v27  ;;  %v598_v20 = vadd.f32 %v594_v8, %v579_v18 }
 0x249   :  { %v613_v26 = vpop.permute.xlu0 %612  ;;  %v611_v21 = vpop.permute.xlu1 %610 }
 0x24a   :  { %v617_v25 = vadd.f32 %v613_v26, %v598_v20  ;;  %v616_v28 = vadd.f32 %v611_v21, %v597_v6 }
 0x24c   :  { %v636_v29 = vadd.f32 %v634_v22, %v617_v25  ;;  %v635_v24 = vadd.f32 %v633_v38, %v616_v28  ;;  %v32_v22 = vld [vmem:[%s1496_s7] sm:$0x1] }
 0x24d   :  { %v651_v30 = vpop.permute.xlu0 %650  ;;  %v649_v23 = vpop.permute.xlu1 %648 }
 0x24e   :  { %v655_v58 = vadd.f32 %v651_v30, %v636_v29  ;;  %v654_v31 = vadd.f32 %v649_v23, %v635_v24  ;;  %v33_v29 = vld [vmem:[%s1496_s7 + $0x1] sm:$0x1] }
 0x251   :  { %v668_v32 = vpop.permute.xlu0 %667  ;;  %v670_v33 = vpop.permute.xlu1 %669 }
 0x252   :  { %v673_v60 = vadd.f32 %v668_v32, %v654_v31  ;;  %v674_v35 = vadd.f32 %v670_v33, %v655_v58  ;;  %v34_v31 = vld [vmem:[%s1496_s7 + $0x2] sm:$0x1] }
 0x254   :  { %v692_v59 = vadd.f32 %v690_v36, %v673_v60  ;;  %v693_v34 = vadd.f32 %v691_v37, %v674_v35 }
 0x255   :  { %v706_v10 = vpop.permute.xlu0 %705  ;;  %v708_v39 = vpop.permute.xlu1 %707 }
 0x256   :  { %v711_v46 = vadd.f32 %v706_v10, %v692_v59  ;;  %v712_v47 = vadd.f32 %v708_v39, %v693_v34  ;;  %v831_v39 = vld [vmem:[%s1494_s5] sm:$0xff]  ;;  %s1018_s5 = smov [#allocation3]  }
 0x257   :  { %s905_s7 = sshll.u32 %s1018_s5, 4  ;;  %s906_s7 = int_to_ptr.vmem [resolvable:$true] %s905_s7 }
 0x258   :  { %s984_s22 = scalar_lea.vmem %s906_s7, 256  ;;  %p989_p1 = scmp.lt.s32.totalorder %s906_s7, %s906_s7 }
 0x259   :  { %v725_v48 = vpop.permute.xlu0 %724  ;;  %v727_v2 = vpop.permute.xlu1 %726  ;;  %p985_p0 = scmp.ne.s32.totalorder %s906_s7, %s984_s22  ;;  %p990_p2 = scmp.lt.s32.totalorder %s984_s22, %s984_s22 }
 0x25a   :  { %v730_v51 = vadd.f32 %v725_v48, %v711_v46  ;;  %v731_v52 = vadd.f32 %v727_v2, %v712_v47 }
 0x25b   :  { %p991_p3 = por %p990_p2, %p989_p1 }
 0x25c   :  { %v749_v53 = vadd.f32 %v747_v49, %v730_v51  ;;  %v750_v50 = vadd.f32 %v748_v45, %v731_v52  ;;  %v1017_v49 = vmov 5  }
 0x25d   :  { %v763_v11 = vpop.permute.xlu1 %762  ;;  %974 = vset.pattern.permute.xlu1 %v1017_v49  ;;  %975 = vset.pattern.permute.xlu0 %v1017_v49  ;;  %p992_p4 = pnand %p991_p3, %p985_p0 }
 0x25e   :  { %v768_v41 = vadd.f32 %v763_v11, %v749_v53 }
 0x261   :  { %v765_v54 = vpop.permute.xlu1 %764 }
 0x262   :  { %v769_v61 = vadd.f32 %v765_v54, %v750_v50 }
 0x265   :  { %v784_v55 = vpop.permute.xlu1 %783 }
 0x266   :  { %v788_v62 = vadd.f32 %v784_v55, %v769_v61 }
 0x26a   :  { %v791_v63 = vpop.permute.xlu0 %790 }
 0x26b   :  { %v1440_v1 = vadd.f32 %v791_v63, %v788_v62 }
 0x26d   :  { %v796_v7 = vand.u32 2147483647, %v1440_v1 }
 0x26e   :  { %v782_v0 = vpop.permute.xlu0 %781 }
 0x26f   :  { %v787_v3 = vadd.f32 %v782_v0, %v768_v41  ;;  %v801_v40 = vsel %vm797_vm4, %v796_v7, 0.0 }
 0x270   :  { %802 = vadd.xlane.f32.xlu1 %v801_v40 }
 0x271   :  { %v1444_v12 = vadd.f32 %v791_v63, %v787_v3 }
 0x273   :  { %v795_v43 = vand.u32 2147483647, %v1444_v12 }
 0x275   :  { %v798_v4 = vsel %vm797_vm4, %v795_v43, 0.0 }
 0x276   :  { %799 = vadd.xlane.f32.xlu0 %v798_v4 }
 0x2fd   :  { %v803_v42 = vpop.xlane.xlu1 %802 }
 0x2fe   :  { %v805_v5 = vmul.f32 0.125, %v803_v42 }
 0x300   :  { %v808_v56 = vmul.f32 %v806_v57, %v805_v5 }
 0x302   :  { %v816_v15 = vsel %vm797_vm4, %v808_v56, 0.0 }
 0x303   :  { %v817_v16 = vrot.slane %v816_v15, 4  ;;  %v800_v17 = vpop.xlane.xlu0 %799 }
 0x304   :  { %v804_v27 = vmul.f32 0.125, %v800_v17 }
 0x305   :  { %v818_v18 = vadd.f32 %v817_v16, %v816_v15 }
 0x306   :  { %v807_v19 = vmul.f32 %v806_v57, %v804_v27 }
 0x307   :  { %v819_v8 = vrot.slane %v818_v18, 2 }
 0x308   :  { %v809_v6 = vsel %vm797_vm4, %v807_v19, 0.0 }
 0x309   :  { %v820_v20 = vadd.f32 %v819_v8, %v818_v18  ;;  %v810_v26 = vrot.slane %v809_v6, 4 }
 0x30b   :  { %v821_v21 = vrot.slane %v820_v20, 1  ;;  %v811_v38 = vadd.f32 %v810_v26, %v809_v6 }
 0x30d   :  { %v822_v25 = vadd.f32 %v821_v21, %v820_v20  ;;  %v812_v28 = vrot.slane %v811_v38, 2 }
 0x30f   :  { %v813_v24 = vadd.f32 %v812_v28, %v811_v38  ;;  %v824_v30 = vadd.f32 %v822_v25, %v32_v22 }
 0x311   :  { %v814_v23 = vrot.slane %v813_v24, 1  ;;  %v826_v58 = vmul.f32 %v824_v30, %v33_v29 }
 0x313   :  { %v815_v32 = vadd.f32 %v814_v23, %v813_v24  ;;  %v828_v36 = vadd.f32 %v826_v58, %v34_v31 }
 0x315   :  { %v823_v33 = vadd.f32 %v815_v32, %v32_v22  ;;  %v830_v35 = vmax.f32 %v828_v36, 0.0 }
 0x317   :  { %v825_v37 = vmul.f32 %v823_v33, %v33_v29  ;;  %v839_v10 = vrot.slane %v830_v35, %v1155_v44 }
 0x319   :  { %v827_v60 = vadd.f32 %v825_v37, %v34_v31  ;;  %v841_v48 = vmul.f32 %v839_v10, %v831_v39 }
 0x31b   :  { %v829_v59 = vmax.f32 %v827_v60, 0.0  ;;  %v845_v2 = vsel %vm797_vm4, %v841_v48, 0.0 }
 0x31d   :  { %v835_v34 = vrot.slane %v829_v59, %v1155_v44 }
 0x31f   :  { %v840_v46 = vmul.f32 %v835_v34, %v831_v39 }
 0x321   :  { %v842_v47 = vsel %vm797_vm4, %v840_v46, 0.0 }
 0x322   :  { %843 = vadd.xlane.f32.xlu0 %v842_v47 }
 0x326   :  { %846 = vadd.xlane.f32.xlu0 %v845_v2 }
 0x3af   :  { %v844_v45 = vpop.xlane.xlu0 %843 }
 0x3b0   :  { %v848_v51 = vadd.f32 %v844_v45, %v1093_v9 }
 0x3b2   :  { %v950_v52 = vmul.f32 -1.442695, %v848_v51 }
 0x3b3   :  { %v847_v44 = vpop.xlane.xlu0 %846 }
 0x3b4   :  { %976 = vpow2.f32 %v950_v52  ;;  %v849_v53 = vadd.f32 %v847_v44, %v1093_v9 }
 0x3b6   :  { %v951_v50 = vmul.f32 -1.442695, %v849_v53 }
 0x3b8   :  { %978 = vpow2.f32 %v951_v50 }
 0x3be   :  { %v977_v11 = vpop.eup %976 }
 0x3bf   :  { %v856_v54 = vadd.f32 1.0, %v977_v11 }
 0x3c1   :  { %980 = vrcp.f32 %v856_v54 }
 0x3c2   :  { %v979_v55 = vpop.eup %978 }
 0x3c3   :  { %v857_v61 = vadd.f32 1.0, %v979_v55 }
 0x3c5   :  { %982 = vrcp.f32 %v857_v61 }
 0x3cb   :  { %v981_v62 = vpop.eup %980 }
 0x3cc   :  { %v862_v63 = vmul.f32 %v981_v62, %v804_v27 }
 0x3ce   :  { %v864_v41 = vsub.f32 0.0, %v862_v63 }
 0x3cf   :  { %v983_v7 = vpop.eup %982 }
 0x3d0   :  { %868 = vperm.xlu1 %974, %v864_v41   ;;  %v863_v0 = vmul.f32 %v983_v7, %v805_v5 }
 0x3d2   :  { %v865_v3 = vsub.f32 0.0, %v863_v0 }
 0x3d4   :  { %880 = vperm.xlu1 %974, %v862_v63   ;;  %873 = vperm.xlu0 %975, %v865_v3  }
 0x3d8   :  { %885 = vperm.xlu1 %974, %v863_v0  }
 0x44f   :  { %v869_v40 = vpop.permute.xlu1 %868 }
 0x450   :  { %v876_v9 = vmax.f32 %v869_v40, %v1444_v12 }
 0x453   :  { %v874_v43 = vpop.permute.xlu0 %873  ;;  %v881_v4 = vpop.permute.xlu1 %880 }
 0x454   :  { %v888_v57 = vmin.f32 %v881_v4, %v876_v9  ;;  %v877_v42 = vmax.f32 %v874_v43, %v1440_v1 }
 0x456   :  { %v890_v56 = vsub.f32 %v1444_v12, %v888_v57 }
 0x457   :  { %v886_v15 = vpop.permute.xlu1 %885 }
 0x458   :  { %v892_v16 = vadd.f32 %v890_v56, %v1100_v13  ;;  %898 = vst.msk [vmem:[#allocation3] sm:$0xf0] %vm897_vm5, %v890_v56  ;;  %v889_v5 = vmin.f32 %v886_v15, %v877_v42 }
 0x45a   :  { %895 = vst.msk [vmem:[#allocation3] sm:$0xf] %vm894_vm6, %v892_v16  ;;  %v891_v17 = vsub.f32 %v1440_v1, %v889_v5 }
 0x45c   :  { %v893_v27 = vadd.f32 %v891_v17, %v1105_v14  ;;  %899 = vst.msk [vmem:[#allocation3 + $0x8] sm:$0xf0] %vm897_vm5, %v891_v17 }
 0x45e   :  { %896 = vst.msk [vmem:[#allocation3 + $0x8] sm:$0xf] %vm894_vm6, %v893_v27 }
 0x45f   :  { %995 = shalt.err (!%p992_p4)
}
 0x460   :  { %s996_s24 = scalar_lea.hbm %s1497_s8, 256 }
 0x461   :  { %p997_p5 = scmp.ne.s32.totalorder %s1497_s8, %s996_s24  ;;  %p1000_p6 = scmp.lt.u32.totalorder %s996_s24, %s1497_s8 }
 0x463   :  { %p1002_p7 = pnand %p1000_p6, %p997_p5 }
 0x465   :  { %1005 = shalt.err (!%p1002_p7)
}
 0x466   :  { %s1019_s1 = smov 128   ;;  %s1020_s28 = smov 8  }
 0x467   :  { %911 = dma.vmem_to_hbm [thread:$0]  %s906_s7, 256, %s1497_s8, [#allocation4], %s1019_s1, %s1019_s1, %s1020_s28  }
 0x468   :  { %1006 = dma.done.wait [#allocation4], 256  }
 0x469   :  { %1007 = vsyncadd [#allocation4], 4294967040 }
 0x46a   :  { %915 = vsyncpa [#allocation4], 1 }

</bundles_post_ra>
